<compile_context>
chip_gen: v5e
topology: v5e:2x2
jax: 0.10.0
libtpu: 0.0.40
codegen_flags: <defaults>
</compile_context>

<pallas_src>
import jax
import jax.numpy as jnp
from jax.experimental import pallas as pl
from jax.experimental.pallas import tpu as pltpu


def _round_up(n, m):
    return ((n + m - 1) // m) * m


def nade_kernel(x_ref, w_ref, u_ref, vt_ref, bt_ref, c_ref, p_ref):
    # x_ref : (TB, 1, Dp)  batch tile of x, D on lanes
    # w_ref : (Hp, Dp)     torch `w` (zero-padded), VMEM-resident
    # u_ref : (Dp, Dp)     strictly-upper-triangular ones, bf16, VMEM-resident
    # vt_ref: (Hp, Dp)     v^T (zero-padded), VMEM-resident
    # bt_ref: (1, Dp)      b^T
    # c_ref : (Hp, 1)      c
    # p_ref : (TB, Dp)     output probabilities for this batch tile (lane-dense)
    TB = x_ref.shape[0]
    Hp, Dp = w_ref.shape

    x_tile = x_ref[...]                                    # (TB, 1, Dp)
    # xw[t, h, j] = w[h, j] * x[t, j] ; multiply in f32, feed MXU in bf16.
    xw = (x_tile * w_ref[...]).astype(jnp.bfloat16)        # (TB, Hp, Dp)
    xw_m = xw.reshape(TB * Hp, Dp)                         # free merge (Hp % 8 == 0)

    # A[t*Hp+h, d] = sum_{j<d} w[h, j] * x[t, j]   -- single bf16 MXU matmul, f32 acc
    a = jnp.dot(xw_m, u_ref[...], preferred_element_type=jnp.float32)
    a3 = a.reshape(TB, Hp, Dp) + c_ref[...][None, :, :]    # + c[h]

    h3 = jax.nn.sigmoid(a3)                                # (TB, Hp, Dp), f32 EUP

    # logits[t, d] = sum_h v[d, h] * h3[t, h, d] + b[d]
    logits = jnp.sum(vt_ref[...][None, :, :] * h3, axis=1) + bt_ref[...]   # (TB, Dp)
    p_ref[...] = jax.nn.sigmoid(logits).astype(p_ref.dtype)               # dense store


def nade_forward(x, w, b, v, c, *, batch_tile=8):
    """Pallas NADE forward.

    x : (D, B), w : (H, D), b : (D, 1), v : (D, H), c : (H, 1)
    Returns (p_x, x_s) like the torch module; x_s == [] because x is given.
    """
    D, B = x.shape
    H = w.shape[0]
    f32 = jnp.float32

    Dp = _round_up(max(D, 1), 128)          # lane-dense loads/stores
    Hp = _round_up(max(H, 1), 8)            # sublane-aligned leading-dim merge
    TB = _round_up(max(batch_tile, 1), 8)   # batch tile (output sublane rule)
    Bp = _round_up(max(B, 1), TB)
    grid_b = Bp // TB

    # Zero padding is semantically inert: padded x/w columns add 0 to the prefix
    # sums and padded v rows add 0 to the h-reduction.
    x_p = jnp.zeros((Bp, 1, Dp), f32).at[:B, 0, :D].set(x.T.astype(f32))
    w_p = jnp.zeros((Hp, Dp), f32).at[:H, :D].set(w.astype(f32))
    vt_p = jnp.zeros((Hp, Dp), f32).at[:H, :D].set(v.T.astype(f32))
    bt_p = jnp.zeros((1, Dp), f32).at[0, :D].set(b[:, 0].astype(f32))
    c_p = jnp.zeros((Hp, 1), f32).at[:H, 0].set(c[:, 0].astype(f32))

    # Strictly-upper-triangular ones (U[j, d] = 1 iff j < d), built ONCE, exact in bf16.
    u = (jnp.arange(Dp, dtype=jnp.int32)[:, None]
         < jnp.arange(Dp, dtype=jnp.int32)[None, :]).astype(jnp.bfloat16)

    # Explicit VMEM budget with headroom (double-buffered x / out blocks, resident
    # weights + U, and the (TB*Hp, Dp) f32 intermediates).
    vmem_bytes = int(
        2 * TB * Dp * 4                 # x blocks (double-buffered)
        + 2 * TB * Dp * 4               # output blocks (double-buffered)
        + 2 * Hp * Dp * 4               # w, v^T resident
        + Dp * Dp * 2                   # U (bf16) resident
        + 8 * Dp * 4 + Hp * 128 * 4     # b^T, c (padded tiles)
        + 4 * TB * Hp * Dp * 4          # xw / a / h intermediates
    )
    vmem_limit = min(64 * 1024 * 1024, max(4 * 1024 * 1024, 2 * vmem_bytes))

    p_pad = pl.pallas_call(
        nade_kernel,
        out_shape=jax.ShapeDtypeStruct((Bp, Dp), f32),
        grid_spec=pltpu.PrefetchScalarGridSpec(
            num_scalar_prefetch=0,
            grid=(grid_b,),
            in_specs=[
                pl.BlockSpec((TB, 1, Dp), lambda bb: (bb, 0, 0)),   # x batch tile
                pl.BlockSpec((Hp, Dp), lambda bb: (0, 0)),          # w   (resident)
                pl.BlockSpec((Dp, Dp), lambda bb: (0, 0)),          # U   (resident)
                pl.BlockSpec((Hp, Dp), lambda bb: (0, 0)),          # v^T (resident)
                pl.BlockSpec((1, Dp), lambda bb: (0, 0)),           # b^T (resident)
                pl.BlockSpec((Hp, 1), lambda bb: (0, 0)),           # c   (resident)
            ],
            out_specs=pl.BlockSpec((TB, Dp), lambda bb: (bb, 0)),
        ),
        compiler_params=pltpu.CompilerParams(
            dimension_semantics=("parallel",),   # batch tiles shard across TCs (v7x)
            vmem_limit_bytes=vmem_limit,
        ),
    )(x_p, w_p, u, vt_p, bt_p, c_p)

    # Slice padding away; transpose to the torch layout (D, B).  For large B*D a
    # consumer that accepts (B, D) should take p_pad[:B, :D] directly to skip the
    # extra XLA transpose pass.
    p_x = p_pad[:B, :D].T
    return p_x, []


def nade_ref(x, w, b, v, c):
    """Pure-JAX reference mirroring the torch loop (for correctness check)."""
    D, B = x.shape
    a = c
    ps = []
    for i in range(D):
        h = jax.nn.sigmoid(a)
        p_i = jax.nn.sigmoid(v[i:i + 1, :] @ h + b[i:i + 1])
        ps.append(jnp.broadcast_to(p_i, (1, B)))
        a = w[:, i:i + 1] @ x[i:i + 1] + a
    return jnp.concatenate(ps, axis=0)


if __name__ == "__main__":
    D, H, B = 16, 32, 2   # input_dim, hidden_dim, batch

    key = jax.random.PRNGKey(0)
    k1, k2, k3, k4, k5 = jax.random.split(key, 5)
    # Deterministic synthetic parameters (module inits them to zeros; use small
    # random values so the kernel does non-trivial work).
    w = 0.1 * jax.random.normal(k1, (H, D), jnp.float32)
    b = 0.1 * jax.random.normal(k2, (D, 1), jnp.float32)
    v = 0.1 * jax.random.normal(k3, (D, H), jnp.float32)
    c = 0.1 * jax.random.normal(k4, (H, 1), jnp.float32)
    x = jax.random.bernoulli(k5, 0.5, (D, B)).astype(jnp.float32)

    p_x, x_s = nade_forward(x, w, b, v, c)
    p_x = jax.block_until_ready(p_x)

    p_expected = nade_ref(x, w, b, v, c)
    assert p_x.shape == (D, B)
    # bf16 MXU operands (w*x terms rounded to bf16) -> allow ~1e-3 drift vs f32 ref.
    assert jnp.allclose(p_x, p_expected, atol=2e-3, rtol=2e-3), "mismatch vs reference"
    print("KERNEL_OK")
</pallas_src>

<mosaic_0001>
module attributes {stable_mosaic.version = 11 : i64} {
  func.func @nade_kernel(%arg0: i32, %arg1: memref<8x1x128xf32, #tpu.memory_space<vmem>>, %arg2: memref<32x128xf32, #tpu.memory_space<vmem>>, %arg3: memref<128x128xbf16, #tpu.memory_space<vmem>>, %arg4: memref<32x128xf32, #tpu.memory_space<vmem>>, %arg5: memref<1x128xf32, #tpu.memory_space<vmem>>, %arg6: memref<32x1xf32, #tpu.memory_space<vmem>>, %arg7: memref<8x128xf32, #tpu.memory_space<vmem>>) attributes {dimension_semantics = [#tpu.dimension_semantics<parallel>], iteration_bounds = array<i64: 1>, scalar_prefetch = 0 : i64, scratch_operands = 0 : i64, tpu.core_type = #tpu.core_type<tc>, window_params = [{transform_indices = @transform_0, window_bounds = array<i64: 8, 1, 128>}, {pipeline_mode = #tpu.pipeline_mode<synchronous>, transform_indices = @transform_1, window_bounds = array<i64: 32, 128>}, {pipeline_mode = #tpu.pipeline_mode<synchronous>, transform_indices = @transform_2, window_bounds = array<i64: 128, 128>}, {pipeline_mode = #tpu.pipeline_mode<synchronous>, transform_indices = @transform_3, window_bounds = array<i64: 32, 128>}, {pipeline_mode = #tpu.pipeline_mode<synchronous>, transform_indices = @transform_4, window_bounds = array<i64: 1, 128>}, {pipeline_mode = #tpu.pipeline_mode<synchronous>, transform_indices = @transform_5, window_bounds = array<i64: 32, 1>}, {transform_indices = @transform_6, window_bounds = array<i64: 8, 128>}]} {
    %c0 = arith.constant 0 : index
    %c0_0 = arith.constant 0 : index
    %c0_1 = arith.constant 0 : index
    %0 = vector.load %arg1[%c0, %c0_0, %c0_1] : memref<8x1x128xf32, #tpu.memory_space<vmem>>, vector<8x1x128xf32>
    %c0_2 = arith.constant 0 : index
    %c0_3 = arith.constant 0 : index
    %1 = vector.load %arg2[%c0_2, %c0_3] : memref<32x128xf32, #tpu.memory_space<vmem>>, vector<32x128xf32>
    %2 = vector.shape_cast %1 : vector<32x128xf32> to vector<1x32x128xf32>
    %3 = vector.broadcast %0 : vector<8x1x128xf32> to vector<8x32x128xf32>
    %4 = vector.broadcast %2 : vector<1x32x128xf32> to vector<8x32x128xf32>
    %5 = arith.mulf %3, %4 : vector<8x32x128xf32>
    %6 = arith.truncf %5 : vector<8x32x128xf32> to vector<8x32x128xbf16>
    %7 = vector.shape_cast %6 : vector<8x32x128xbf16> to vector<256x128xbf16>
    %c0_4 = arith.constant 0 : index
    %c0_5 = arith.constant 0 : index
    %8 = vector.load %arg3[%c0_4, %c0_5] : memref<128x128xbf16, #tpu.memory_space<vmem>>, vector<128x128xbf16>
    %cst = arith.constant dense<0.000000e+00> : vector<256x128xf32>
    %9 = tpu.matmul %7, %8, %cst {dimension_numbers = #tpu.dot_dimension_numbers<[1], [0], [0], [1], [0, 0, 1, 1], [], []>} : vector<256x128xbf16>, vector<128x128xbf16>, vector<256x128xf32> -> vector<256x128xf32>
    %10 = vector.shape_cast %9 : vector<256x128xf32> to vector<8x32x128xf32>
    %c0_6 = arith.constant 0 : index
    %c0_7 = arith.constant 0 : index
    %11 = vector.load %arg6[%c0_6, %c0_7] : memref<32x1xf32, #tpu.memory_space<vmem>>, vector<32x1xf32>
    %12 = vector.shape_cast %11 : vector<32x1xf32> to vector<1x32x1xf32>
    %13 = vector.broadcast %12 : vector<1x32x1xf32> to vector<8x32x128xf32>
    %14 = arith.addf %10, %13 : vector<8x32x128xf32>
    %15 = arith.negf %14 : vector<8x32x128xf32>
    %16 = math.exp %15 : vector<8x32x128xf32>
    %cst_8 = arith.constant 1.000000e+00 : f32
    %17 = vector.broadcast %cst_8 : f32 to vector<8x32x128xf32>
    %18 = arith.addf %17, %16 : vector<8x32x128xf32>
    %19 = arith.divf %17, %18 : vector<8x32x128xf32>
    %c0_9 = arith.constant 0 : index
    %c0_10 = arith.constant 0 : index
    %20 = vector.load %arg4[%c0_9, %c0_10] : memref<32x128xf32, #tpu.memory_space<vmem>>, vector<32x128xf32>
    %21 = vector.shape_cast %20 : vector<32x128xf32> to vector<1x32x128xf32>
    %22 = vector.broadcast %21 : vector<1x32x128xf32> to vector<8x32x128xf32>
    %23 = arith.mulf %22, %19 : vector<8x32x128xf32>
    %cst_11 = arith.constant dense<0.000000e+00> : vector<8x128xf32>
    %24 = vector.multi_reduction <add>, %23, %cst_11 [1] : vector<8x32x128xf32> to vector<8x128xf32>
    %c0_12 = arith.constant 0 : index
    %c0_13 = arith.constant 0 : index
    %25 = vector.load %arg5[%c0_12, %c0_13] : memref<1x128xf32, #tpu.memory_space<vmem>>, vector<1x128xf32>
    %26 = vector.broadcast %25 : vector<1x128xf32> to vector<8x128xf32>
    %27 = arith.addf %24, %26 : vector<8x128xf32>
    %28 = arith.negf %27 : vector<8x128xf32>
    %29 = math.exp %28 : vector<8x128xf32>
    %cst_14 = arith.constant 1.000000e+00 : f32
    %30 = vector.broadcast %cst_14 : f32 to vector<8x128xf32>
    %31 = arith.addf %30, %29 : vector<8x128xf32>
    %32 = arith.divf %30, %31 : vector<8x128xf32>
    %c0_15 = arith.constant 0 : index
    %c0_16 = arith.constant 0 : index
    %33 = vector.load %arg7[%c0_15, %c0_16] : memref<8x128xf32, #tpu.memory_space<vmem>>, vector<8x128xf32>
    tpu.vector_store %arg7[%c0_15, %c0_16], %32 {strides = array<i32>} : memref<8x128xf32, #tpu.memory_space<vmem>>, vector<8x128xf32>,
    return
  }
  func.func @transform_0(%arg0: i32) -> (i32, i32, i32) {
    %c0_i32 = arith.constant 0 : i32
    %c0_i32_0 = arith.constant 0 : i32
    %c0_i32_1 = arith.constant 0 : i32
    return %arg0, %c0_i32, %c0_i32_0 : i32, i32, i32
  }
  func.func @transform_1(%arg0: i32) -> (i32, i32) {
    %c0_i32 = arith.constant 0 : i32
    %c0_i32_0 = arith.constant 0 : i32
    %c0_i32_1 = arith.constant 0 : i32
    return %c0_i32, %c0_i32_0 : i32, i32
  }
  func.func @transform_2(%arg0: i32) -> (i32, i32) {
    %c0_i32 = arith.constant 0 : i32
    %c0_i32_0 = arith.constant 0 : i32
    %c0_i32_1 = arith.constant 0 : i32
    return %c0_i32, %c0_i32_0 : i32, i32
  }
  func.func @transform_3(%arg0: i32) -> (i32, i32) {
    %c0_i32 = arith.constant 0 : i32
    %c0_i32_0 = arith.constant 0 : i32
    %c0_i32_1 = arith.constant 0 : i32
    return %c0_i32, %c0_i32_0 : i32, i32
  }
  func.func @transform_4(%arg0: i32) -> (i32, i32) {
    %c0_i32 = arith.constant 0 : i32
    %c0_i32_0 = arith.constant 0 : i32
    %c0_i32_1 = arith.constant 0 : i32
    return %c0_i32, %c0_i32_0 : i32, i32
  }
  func.func @transform_5(%arg0: i32) -> (i32, i32) {
    %c0_i32 = arith.constant 0 : i32
    %c0_i32_0 = arith.constant 0 : i32
    %c0_i32_1 = arith.constant 0 : i32
    return %c0_i32, %c0_i32_0 : i32, i32
  }
  func.func @transform_6(%arg0: i32) -> (i32, i32) {
    %c0_i32 = arith.constant 0 : i32
    %c0_i32_0 = arith.constant 0 : i32
    return %arg0, %c0_i32 : i32, i32
  }
}

</mosaic_0001>

<bundles_post_ra>
// kernel: tpu_custom_call.1
= control target key start
LH: loop header
LB: loop body
LE: loop exit
PB: predicated region body
PF: predicated region fallthrough
CT: control target
= control target key end

     0   :  { %11 = vsyncpa [#allocation3], 0  ;;  %s3031_s0 = inlined_call_operand.hbm [shape: f32[8,1,128], index: 0, kind: input, shape index: {}]   ;;  %s3032_s1 = inlined_call_operand.vmem [shape: f32[32,128], index: 1, kind: input, shape index: {}]   ;;  %s3033_s2 = inlined_call_operand.hbm [shape: bf16[128,128], index: 2, kind: input, shape index: {}]   ;;  %s3034_s3 = inlined_call_operand.hbm [shape: f32[32,128], index: 3, kind: input, shape index: {}]   ;;  %s3035_s4 = inlined_call_operand.vmem [shape: f32[1,128], index: 4, kind: input, shape index: {}]   ;;  %s3036_s5 = inlined_call_operand.vmem [shape: f32[32,1], index: 5, kind: input, shape index: {}]   ;;  %s3037_s6 = inlined_call_operand.hbm [shape: f32[8,128], index: 6, kind: output, shape index: {}]  }
   0x1   :  { %12 = vsyncpa [#allocation6], 0  ;;  %s33_s23 = sshll.u32 %s3033_s2, 4  ;;  %s34_s23 = int_to_ptr.hbm [resolvable:$true] %s33_s23 }
   0x2   :  { %13 = vsyncpa [#allocation4], 0  ;;  %s1795_s24 = smov [#allocation5]   ;;  %s18_s28 = sshll.u32 %s3031_s0, 4  ;;  %s19_s28 = int_to_ptr.hbm [resolvable:$true] %s18_s28 }
   0x3   :  { %s35_s25 = sshll.u32 %s1795_s24, 4  ;;  %s1796_s29 = smov 64   ;;  %s36_s25 = int_to_ptr.vmem [resolvable:$true] %s35_s25 }
   0x4   :  { %s1797_s30 = smov 4   ;;  %s1798_s7 = smov [#allocation2]  }
   0x5   :  { %41 = dma.hbm_to_vmem [thread:$0]  %s34_s23, 1024, %s36_s25, [#allocation6], %s1796_s29, %s1796_s29, %s1797_s30  }
   0x6   :  { %s20_s8 = sshll.u32 %s1798_s7, 4  ;;  %s1799_s9 = smov 16   ;;  %s21_s8 = int_to_ptr.vmem [resolvable:$true] %s20_s8 }
   0x7   :  { %s1800_s10 = smov 1   ;;  %s46_s12 = sshll.u32 %s3034_s3, 4  ;;  %s47_s12 = int_to_ptr.hbm [resolvable:$true] %s46_s12 }
   0x8   :  { %26 = dma.hbm_to_vmem [thread:$0]  %s19_s28, 128, %s21_s8, [#allocation3], %s1799_s9, %s1799_s9, %s1800_s10  }
   0x9   :  { %s1801_s13 = smov [#allocation7]   ;;  %s1802_s15 = smov 128  }
   0xa   :  { %s48_s14 = sshll.u32 %s1801_s13, 4  ;;  %s1803_s0 = smov 8   ;;  %s49_s14 = int_to_ptr.vmem [resolvable:$true] %s48_s14 }
   0xb   :  { %54 = dma.hbm_to_vmem [thread:$0]  %s47_s12, 512, %s49_s14, [#allocation6], %s1802_s15, %s1802_s15, %s1803_s0  }
   0xc   :  { %1789 = dma.done.wait [#allocation3], 128  }
   0xd   :  { %1790 = vsyncadd [#allocation3], 4294967168 }
   0xe   :  { %1791 = dma.done.wait [#allocation6], 1536  }
   0xf   :  { %1792 = vsyncadd [#allocation6], 4294965760  ;;  %v1484_v0 = vld [vmem:[#allocation5 + $0x38] sm:$0xff]  ;;  %v1483_v1 = vld [vmem:[#allocation5 + $0x30] sm:$0xff]  ;;  %v1804_v2 = vmov 0   ;;  %s1394_s10 = sshll.u32 %s3037_s6, 4  ;;  %s1395_s10 = int_to_ptr.hbm [resolvable:$true] %s1394_s10 }
  0x10   :  { %331 = vmatpush.bf16.msra.mxu0 %v1484_v0  ;;  %1485 = vmatpush.bf16.msra.mxu1 %v1484_v0  ;;  %v1482_v3 = vld [vmem:[#allocation5 + $0x28] sm:$0xff]  ;;  %v420_v4 = vld [vmem:[%s3036_s5] sm:$0xff]  ;;  %v1481_v5 = vld [vmem:[#allocation5 + $0x20] sm:$0xff] }
  0x11   :  { %1486 = vmatpush.bf16.msra.mxu2 %v1484_v0  ;;  %1487 = vmatpush.bf16.msra.mxu3 %v1484_v0  ;;  %v1853_v6 = vld [vmem:[#allocation2] ss:$0 sm:$0xff]  ;;  %v1860_v8 = vld [vmem:[#allocation2 + $0x2] ss:$0 sm:$0xff]  ;;  %v1862_v9 = vld [vmem:[#allocation2 + $0x4] ss:$0 sm:$0xff] }
  0x12   :  { %1520 = vset.pattern.permute.xlu0 %v1804_v2  ;;  %1521 = vset.pattern.permute.xlu1 %v1804_v2  ;;  %v1858_v7 = vld [vmem:[%s3032_s1] sm:$0xff]  ;;  %v1867_v11 = vld [vmem:[%s3032_s1 + $0x8] sm:$0xff]  ;;  %v1479_v18 = vld [vmem:[#allocation5 + $0x10] sm:$0xff] }
  0x13   :  { %426 = vperm.xlu0 %1520, %v420_v4   ;;  %v1480_v10 = vld [vmem:[#allocation5 + $0x18] sm:$0xff]  ;;  %v107_v13 = vmul.f32 %v1853_v6, %v1858_v7  ;;  %v108_v14 = vmul.f32 %v1853_v6, %v1867_v11  ;;  %v115_v15 = vmul.f32 %v1860_v8, %v1858_v7  ;;  %v116_v16 = vmul.f32 %v1860_v8, %v1867_v11  ;;  %v421_v22 = vld [vmem:[%s3036_s5 + $0x8] sm:$0xff]  ;;  %v422_v23 = vld [vmem:[%s3036_s5 + $0x10] sm:$0xff] }
  0x14   :  { %332 = vmatpush.bf16.msra.mxu0 %v1483_v1  ;;  %1488 = vmatpush.bf16.msra.mxu1 %v1483_v1  ;;  %v1869_v12 = vld [vmem:[#allocation2 + $0x6] ss:$0 sm:$0xff]  ;;  %v123_v17 = vmul.f32 %v1862_v9, %v1858_v7  ;;  %v124_v19 = vmul.f32 %v1862_v9, %v1867_v11  ;;  %v1478_v29 = vld [vmem:[#allocation5 + $0x8] sm:$0xff]  ;;  %v1477_v37 = vld [vmem:[#allocation5] sm:$0xff] }
  0x15   :  { %1489 = vmatpush.bf16.msra.mxu2 %v1483_v1  ;;  %1490 = vmatpush.bf16.msra.mxu3 %v1483_v1  ;;  %v131_v20 = vmul.f32 %v1869_v12, %v1858_v7  ;;  %v132_v21 = vmul.f32 %v1869_v12, %v1867_v11  ;;  %v139_v24 = vpack.c.bf16 %v107_v13, %v107_v13  ;;  %v1896_v44 = vld [vmem:[%s3032_s1 + $0x10] sm:$0xff]  ;;  %v1901_v45 = vld [vmem:[%s3032_s1 + $0x18] sm:$0xff] }
  0x16   :  { %436 = vperm.xlu1 %1521, %v422_v23   ;;  %v140_v25 = vpack.c.bf16 %v108_v14, %v108_v14  ;;  %v147_v26 = vpack.c.bf16 %v115_v15, %v115_v15  ;;  %v148_v27 = vpack.c.bf16 %v116_v16, %v116_v16  ;;  %v155_v28 = vpack.c.bf16 %v123_v17, %v123_v17  ;;  %v423_v56 = vld [vmem:[%s3036_s5 + $0x18] sm:$0xff]  ;;  %v1527_v14 = vld [vmem:[#allocation2 + $0x3] ss:$0 sm:$0xff]  ;;  %v1528_v15 = vld [vmem:[#allocation2 + $0x5] ss:$0 sm:$0xff] }
  0x17   :  { %v156_v30 = vpack.c.bf16 %v124_v19, %v124_v19  ;;  %v163_v31 = vpack.c.bf16 %v131_v20, %v131_v20  ;;  %v164_v32 = vpack.c.bf16 %v132_v21, %v132_v21  ;;  %v219_v33 = vunpack.c.l.b16 %v139_v24 }
  0x18   :  { %333 = vmatpush.bf16.msra.mxu0 %v1482_v3  ;;  %1491 = vmatpush.bf16.msra.mxu1 %v1482_v3  ;;  %v220_v34 = vunpack.c.l.b16 %v140_v25  ;;  %v227_v35 = vunpack.c.l.b16 %v147_v26  ;;  %v228_v36 = vunpack.c.l.b16 %v148_v27  ;;  %v235_v38 = vunpack.c.l.b16 %v155_v28 }
  0x19   :  { %1492 = vmatpush.bf16.msra.mxu2 %v1482_v3  ;;  %1493 = vmatpush.bf16.msra.mxu3 %v1482_v3  ;;  %v236_v39 = vunpack.c.l.b16 %v156_v30  ;;  %v243_v40 = vunpack.c.l.b16 %v163_v31  ;;  %v244_v41 = vunpack.c.l.b16 %v164_v32  ;;  %v109_v48 = vmul.f32 %v1853_v6, %v1896_v44 }
  0x1a   :  { %v251_v42 = vpack.c.b16 %v220_v34, %v219_v33  ;;  %v255_v43 = vpack.c.b16 %v228_v36, %v227_v35  ;;  %v110_v49 = vmul.f32 %v1853_v6, %v1901_v45  ;;  %v117_v50 = vmul.f32 %v1860_v8, %v1896_v44 }
  0x1b   :  { %431 = vperm.xlu0 %1520, %v421_v22   ;;  %v259_v46 = vpack.c.b16 %v236_v39, %v235_v38  ;;  %v263_v47 = vpack.c.b16 %v244_v41, %v243_v40  ;;  %v118_v51 = vmul.f32 %v1860_v8, %v1901_v45  ;;  %v125_v52 = vmul.f32 %v1862_v9, %v1896_v44 }
  0x1c   :  { %334 = vmatpush.bf16.msra.mxu0 %v1481_v5  ;;  %1494 = vmatpush.bf16.msra.mxu1 %v1481_v5  ;;  %v126_v53 = vmul.f32 %v1862_v9, %v1901_v45  ;;  %v133_v54 = vmul.f32 %v1869_v12, %v1896_v44  ;;  %v134_v55 = vmul.f32 %v1869_v12, %v1901_v45 }
  0x1d   :  { %1495 = vmatpush.bf16.msra.mxu2 %v1481_v5  ;;  %1496 = vmatpush.bf16.msra.mxu3 %v1481_v5  ;;  %v141_v57 = vpack.c.bf16 %v109_v48, %v109_v48  ;;  %v142_v58 = vpack.c.bf16 %v110_v49, %v110_v49  ;;  %v149_v59 = vpack.c.bf16 %v117_v50, %v117_v50 }
  0x1e   :  { %441 = vperm.xlu1 %1521, %v423_v56   ;;  %v150_v60 = vpack.c.bf16 %v118_v51, %v118_v51  ;;  %v157_v61 = vpack.c.bf16 %v125_v52, %v125_v52  ;;  %v158_v62 = vpack.c.bf16 %v126_v53, %v126_v53  ;;  %v165_v63 = vpack.c.bf16 %v133_v54, %v133_v54 }
  0x1f   :  { %v166_v0 = vpack.c.bf16 %v134_v55, %v134_v55  ;;  %v221_v1 = vunpack.c.l.b16 %v141_v57  ;;  %v222_v2 = vunpack.c.l.b16 %v142_v58  ;;  %v229_v3 = vunpack.c.l.b16 %v149_v59 }
  0x20   :  { %335 = vmatpush.bf16.msra.mxu0 %v1480_v10  ;;  %1497 = vmatpush.bf16.msra.mxu1 %v1480_v10  ;;  %v230_v4 = vunpack.c.l.b16 %v150_v60  ;;  %v237_v5 = vunpack.c.l.b16 %v157_v61  ;;  %v238_v6 = vunpack.c.l.b16 %v158_v62  ;;  %v245_v8 = vunpack.c.l.b16 %v165_v63 }
  0x21   :  { %1498 = vmatpush.bf16.msra.mxu2 %v1480_v10  ;;  %1499 = vmatpush.bf16.msra.mxu3 %v1480_v10  ;;  %v246_v9 = vunpack.c.l.b16 %v166_v0  ;;  %v1526_v10 = vld [vmem:[#allocation2 + $0x1] ss:$0 sm:$0xff]  ;;  %v252_v12 = vpack.c.b16 %v222_v2, %v221_v1  ;;  %v119_v21 = vmul.f32 %v1527_v14, %v1858_v7  ;;  %v120_v22 = vmul.f32 %v1527_v14, %v1867_v11 }
  0x22   :  { %v256_v13 = vpack.c.b16 %v230_v4, %v229_v3  ;;  %v260_v16 = vpack.c.b16 %v238_v6, %v237_v5  ;;  %v111_v19 = vmul.f32 %v1526_v10, %v1858_v7  ;;  %v112_v20 = vmul.f32 %v1526_v10, %v1867_v11 }
  0x23   :  { %v264_v17 = vpack.c.b16 %v246_v9, %v245_v8  ;;  %v127_v23 = vmul.f32 %v1528_v15, %v1858_v7  ;;  %v128_v24 = vmul.f32 %v1528_v15, %v1867_v11  ;;  %v152_v30 = vpack.c.bf16 %v120_v22, %v120_v22 }
  0x24   :  { %336 = vmatpush.bf16.msra.mxu0 %v1479_v18  ;;  %1500 = vmatpush.bf16.msra.mxu1 %v1479_v18  ;;  %v143_v27 = vpack.c.bf16 %v111_v19, %v111_v19  ;;  %v144_v28 = vpack.c.bf16 %v112_v20, %v112_v20  ;;  %v114_v48 = vmul.f32 %v1526_v10, %v1901_v45 }
  0x25   :  { %1501 = vmatpush.bf16.msra.mxu2 %v1479_v18  ;;  %1502 = vmatpush.bf16.msra.mxu3 %v1479_v18  ;;  %v1529_v18 = vld [vmem:[#allocation2 + $0x7] ss:$0 sm:$0xff]  ;;  %v159_v31 = vpack.c.bf16 %v127_v23, %v127_v23  ;;  %v160_v32 = vpack.c.bf16 %v128_v24, %v128_v24  ;;  %v232_v38 = vunpack.c.l.b16 %v152_v30  ;;  %v121_v49 = vmul.f32 %v1527_v14, %v1896_v44 }
  0x26   :  { %v135_v25 = vmul.f32 %v1529_v18, %v1858_v7  ;;  %v136_v26 = vmul.f32 %v1529_v18, %v1867_v11  ;;  %v223_v35 = vunpack.c.l.b16 %v143_v27  ;;  %v224_v36 = vunpack.c.l.b16 %v144_v28 }
  0x27   :  { %v239_v39 = vunpack.c.l.b16 %v159_v31  ;;  %v240_v40 = vunpack.c.l.b16 %v160_v32  ;;  %v122_v50 = vmul.f32 %v1527_v14, %v1901_v45  ;;  %v129_v51 = vmul.f32 %v1528_v15, %v1896_v44 }
  0x28   :  { %337 = vmatpush.bf16.msra.mxu0 %v1478_v29  ;;  %1503 = vmatpush.bf16.msra.mxu1 %v1478_v29  ;;  %v167_v33 = vpack.c.bf16 %v135_v25, %v135_v25  ;;  %v168_v34 = vpack.c.bf16 %v136_v26, %v136_v26  ;;  %v130_v52 = vmul.f32 %v1528_v15, %v1901_v45 }
  0x29   :  { %1504 = vmatpush.bf16.msra.mxu2 %v1478_v29  ;;  %1505 = vmatpush.bf16.msra.mxu3 %v1478_v29  ;;  %v151_v29 = vpack.c.bf16 %v119_v21, %v119_v21  ;;  %v137_v53 = vmul.f32 %v1529_v18, %v1896_v44  ;;  %v138_v54 = vmul.f32 %v1529_v18, %v1901_v45 }
  0x2a   :  { %v247_v41 = vunpack.c.l.b16 %v167_v33  ;;  %v146_v56 = vpack.c.bf16 %v114_v48, %v114_v48  ;;  %v153_v57 = vpack.c.bf16 %v121_v49, %v121_v49  ;;  %v154_v58 = vpack.c.bf16 %v122_v50, %v122_v50 }
  0x2b   :  { %v161_v59 = vpack.c.bf16 %v129_v51, %v129_v51  ;;  %v162_v60 = vpack.c.bf16 %v130_v52, %v130_v52  ;;  %v169_v61 = vpack.c.bf16 %v137_v53, %v137_v53  ;;  %v170_v62 = vpack.c.bf16 %v138_v54, %v138_v54 }
  0x2c   :  { %338 = vmatpush.bf16.msra.mxu0 %v1477_v37  ;;  %1506 = vmatpush.bf16.msra.mxu1 %v1477_v37  ;;  %v226_v0 = vunpack.c.l.b16 %v146_v56  ;;  %v233_v1 = vunpack.c.l.b16 %v153_v57  ;;  %v234_v2 = vunpack.c.l.b16 %v154_v58 }
  0x2d   :  { %1507 = vmatpush.bf16.msra.mxu2 %v1477_v37  ;;  %1508 = vmatpush.bf16.msra.mxu3 %v1477_v37  ;;  %v231_v37 = vunpack.c.l.b16 %v151_v29  ;;  %v241_v3 = vunpack.c.l.b16 %v161_v59  ;;  %v242_v4 = vunpack.c.l.b16 %v162_v60  ;;  %v249_v5 = vunpack.c.l.b16 %v169_v61 }
  0x2e   :  { %v250_v6 = vunpack.c.l.b16 %v170_v62 }
  0x2f   :  { %339 = vmatmul.bf16.vlgmr.msra.gmra.mxu0 %v251_v42  ;;  %359 = vmatmul.bf16.vlgmr.msra.gmra.mxu1 %v255_v43  ;;  %v248_v42 = vunpack.c.l.b16 %v168_v34  ;;  %v253_v43 = vpack.c.b16 %v224_v36, %v223_v35  ;;  %v257_v7 = vpack.c.b16 %v232_v38, %v231_v37  ;;  %v262_v9 = vpack.c.b16 %v242_v4, %v241_v3 }
  0x30   :  { %379 = vmatmul.bf16.vlgmr.msra.gmra.mxu2 %v259_v46  ;;  %399 = vmatmul.bf16.vlgmr.msra.gmra.mxu3 %v263_v47  ;;  %v261_v46 = vpack.c.b16 %v240_v40, %v239_v39  ;;  %v113_v47 = vmul.f32 %v1526_v10, %v1896_v44  ;;  %v258_v44 = vpack.c.b16 %v234_v2, %v233_v1 }
  0x31   :  { %v265_v11 = vpack.c.b16 %v248_v42, %v247_v41  ;;  %v266_v45 = vpack.c.b16 %v250_v6, %v249_v5 }
  0x32   :  { %v145_v55 = vpack.c.bf16 %v113_v47, %v113_v47 }
  0x34   :  { %v225_v63 = vunpack.c.l.b16 %v145_v55 }
  0x36   :  { %v254_v8 = vpack.c.b16 %v226_v0, %v225_v63 }
  0x3f   :  { %344 = vmatmul.bf16.gmra.mxu0 %v252_v12  ;;  %364 = vmatmul.bf16.gmra.mxu1 %v256_v13 }
  0x40   :  { %384 = vmatmul.bf16.gmra.mxu2 %v260_v16  ;;  %404 = vmatmul.bf16.gmra.mxu3 %v264_v17 }
  0x4f   :  { %349 = vmatmul.bf16.gmra.mxu0 %v253_v43  ;;  %369 = vmatmul.bf16.gmra.mxu1 %v257_v7 }
  0x50   :  { %389 = vmatmul.bf16.gmra.mxu2 %v261_v46  ;;  %409 = vmatmul.bf16.gmra.mxu3 %v265_v11 }
  0x5f   :  { %354 = vmatmul.bf16.gmra.mxu0 %v254_v8  ;;  %374 = vmatmul.bf16.gmra.mxu1 %v258_v44 }
  0x60   :  { %394 = vmatmul.bf16.gmra.mxu2 %v262_v9  ;;  %414 = vmatmul.bf16.gmra.mxu3 %v266_v45 }
  0x85   :  { %v1938_v10 = vpop.permute.xlu0 %426 }
  0x88   :  { %v1965_v48 = vpop.permute.xlu1 %436 }
  0x8d   :  { %v1942_v18 = vpop.permute.xlu0 %431 }
  0xac   :  { %v340_v12 = vpop.f32.mrf.mxu0  ;;  %v360_v13 = vpop.f32.mrf.mxu1 }
  0xad   :  { %v444_v14 = vadd.f32 %v1938_v10, %v340_v12  ;;  %v452_v15 = vadd.f32 %v1938_v10, %v360_v13 }
  0xaf   :  { %v1437_v16 = vmul.f32 -1.442695, %v444_v14  ;;  %v1445_v17 = vmul.f32 -1.442695, %v452_v15 }
  0xb1   :  { %1531 = vpow2.f32 %v1437_v16 }
  0xb2   :  { %1533 = vpow2.f32 %v1445_v17 }
  0xb3   :  { %v380_v19 = vpop.f32.mrf.mxu2  ;;  %v400_v20 = vpop.f32.mrf.mxu3 }
  0xb4   :  { %v460_v21 = vadd.f32 %v1938_v10, %v380_v19  ;;  %v468_v22 = vadd.f32 %v1938_v10, %v400_v20  ;;  %v342_v23 = vpop.f32.mrf.mxu0  ;;  %v362_v24 = vpop.f32.mrf.mxu1 }
  0xb5   :  { %v445_v25 = vadd.f32 %v1942_v18, %v342_v23  ;;  %v453_v26 = vadd.f32 %v1942_v18, %v362_v24 }
  0xb6   :  { %v1453_v27 = vmul.f32 -1.442695, %v460_v21  ;;  %v1461_v28 = vmul.f32 -1.442695, %v468_v22 }
  0xb7   :  { %v1532_v29 = vpop.eup %1531  ;;  %v1438_v32 = vmul.f32 -1.442695, %v445_v25  ;;  %v1446_v34 = vmul.f32 -1.442695, %v453_v26 }
  0xb8   :  { %v1534_v30 = vpop.eup %1533  ;;  %v1948_v31 = vadd.f32 1.0, %v1532_v29  ;;  %1535 = vpow2.f32 %v1453_v27 }
  0xb9   :  { %v1950_v33 = vadd.f32 1.0, %v1534_v30  ;;  %1537 = vpow2.f32 %v1461_v28 }
  0xba   :  { %1539 = vrcp.f32 %v1948_v31  ;;  %v615_v59 = vand.u32 2147483648, %v1948_v31  ;;  %v613_v61 = vand.u32 2147483647, %v1948_v31  ;;  %vm609_vm0 = vweird.f32 %v1948_v31 }
  0xbb   :  { %1541 = vrcp.f32 %v1950_v33  ;;  %v382_v35 = vpop.f32.mrf.mxu2  ;;  %v402_v36 = vpop.f32.mrf.mxu3  ;;  %v733_v1 = vand.u32 2147483647, %v1950_v33  ;;  %vm729_vm1 = vweird.f32 %v1950_v33  ;;  %v735_v8 = vand.u32 2147483648, %v1950_v33 }
  0xbc   :  { %1543 = vpow2.f32 %v1438_v32  ;;  %v461_v37 = vadd.f32 %v1942_v18, %v382_v35  ;;  %v469_v39 = vadd.f32 %v1942_v18, %v402_v36  ;;  %v345_v49 = vpop.f32.mrf.mxu0  ;;  %v365_v63 = vpop.f32.mrf.mxu1  ;;  %v616_v6 = vor.u32 1.1754944e-38, %v615_v59 }
  0xbd   :  { %1545 = vpow2.f32 %v1446_v34  ;;  %v446_v55 = vadd.f32 %v1965_v48, %v345_v49  ;;  %v454_v9 = vadd.f32 %v1965_v48, %v365_v63  ;;  %vm1997_vm3 = vcmp.eq.f32.partialorder %v613_v61, 8.507059e+37 }
  0xbe   :  { %v1536_v38 = vpop.eup %1535  ;;  %v1454_v43 = vmul.f32 -1.442695, %v461_v37  ;;  %v1462_v47 = vmul.f32 -1.442695, %v469_v39  ;;  %vm2004_vm4 = vcmp.eq.f32.partialorder %v733_v1, 8.507059e+37  ;;  %v736_v30 = vor.u32 1.1754944e-38, %v735_v8 }
  0xbf   :  { %v1538_v40 = vpop.eup %1537  ;;  %v1956_v41 = vadd.f32 1.0, %v1536_v38  ;;  %v1439_v62 = vmul.f32 -1.442695, %v446_v55  ;;  %v1447_v34 = vmul.f32 -1.442695, %v454_v9  ;;  %v2068_v55 = vld [vmem:[#allocation7] sm:$0xff] }
  0xc0   :  { %v1958_v42 = vpop.eup %1539  ;;  %v1963_v46 = vadd.f32 1.0, %v1538_v40 }
  0xc1   :  { %v1960_v7 = vpop.eup %1541  ;;  %1547 = vrcp.f32 %v1956_v41  ;;  %v605_v51 = vmul.f32 %v1958_v42, %v1948_v31  ;;  %vm610_vm2 = vweird.f32 %v1958_v42  ;;  %v853_v13 = vand.u32 2147483647, %v1956_v41 }
  0xc2   :  { %v1544_v11 = vpop.eup %1543  ;;  %v725_v52 = vmul.f32 %v1960_v7, %v1950_v33  ;;  %1549 = vpow2.f32 %v1454_v43  ;;  %v855_v16 = vand.u32 2147483648, %v1956_v41  ;;  %v975_v19 = vand.u32 2147483648, %v1963_v46  ;;  %vm2029_vm6 = vmor %vm609_vm0, %vm610_vm2 }
  0xc3   :  { %v1546_v50 = vpop.eup %1545  ;;  %1551 = vrcp.f32 %v1963_v46  ;;  %v1972_v53 = vadd.f32 1.0, %v1544_v11  ;;  %v606_v57 = vsub.f32 1.0, %v605_v51  ;;  %vm730_vm5 = vweird.f32 %v1960_v7  ;;  %v385_v28 = vpop.f32.mrf.mxu2 }
  0xc4   :  { %v1974_v54 = vadd.f32 1.0, %v1546_v50  ;;  %1553 = vpow2.f32 %v1462_v47  ;;  %v726_v58 = vsub.f32 1.0, %v725_v52  ;;  %vm849_vm7 = vweird.f32 %v1956_v41  ;;  %vm2037_vm8 = vmor %vm729_vm1, %vm730_vm5  ;;  %v347_v15 = vpop.f32.mrf.mxu0 }
  0xc5   :  { %1555 = vrcp.f32 %v1972_v53  ;;  %v607_v3 = vmul.f32 %v1958_v42, %v606_v57  ;;  %v973_v32 = vand.u32 2147483647, %v1963_v46  ;;  %vm2041_vm9 = vcmp.eq.f32.partialorder %v853_v13, 8.507059e+37  ;;  %v2109_v13 = vpop.permute.xlu1 %441 }
  0xc6   :  { %1557 = vrcp.f32 %v1974_v54  ;;  %v727_v4 = vmul.f32 %v1960_v7, %v726_v58  ;;  %v856_v31 = vor.u32 1.1754944e-38, %v855_v16  ;;  %v2045_v38 = vor.u32 1.1754944e-38, %v975_v19 }
  0xc7   :  { %v1977_v56 = vpop.eup %1547  ;;  %1559 = vpow2.f32 %v1439_v62  ;;  %v608_v22 = vadd.f32 %v1958_v42, %v607_v3  ;;  %v628_v39 = vand.u32 2147483647, %v1972_v53  ;;  %v462_v11 = vadd.f32 %v1965_v48, %v385_v28 }
  0xc8   :  { %v845_v60 = vmul.f32 %v1977_v56, %v1956_v41  ;;  %v1550_v0 = vpop.eup %1549  ;;  %v728_v23 = vadd.f32 %v1960_v7, %v727_v4  ;;  %vm850_vm10 = vweird.f32 %v1977_v56  ;;  %vm969_vm11 = vweird.f32 %v1963_v46 }
  0xc9   :  { %v1986_v2 = vpop.eup %1551  ;;  %v2002_v14 = vadd.f32 1.0, %v1550_v0  ;;  %v612_v43 = vsel %vm2029_vm6, %v1958_v42, %v608_v22  ;;  %vm624_vm12 = vweird.f32 %v1972_v53  ;;  %v630_v42 = vand.u32 2147483648, %v1972_v53  ;;  %vm2084_vm14 = vmor %vm849_vm7, %vm850_vm10  ;;  %v405_v0 = vpop.f32.mrf.mxu3 }
  0xca   :  { %v1554_v5 = vpop.eup %1553  ;;  %v846_v44 = vsub.f32 1.0, %v845_v60  ;;  %v965_v17 = vmul.f32 %v1986_v2, %v1963_v46  ;;  %v732_v33 = vsel %vm2037_vm8, %v1960_v7, %v728_v23  ;;  %v617_v52 = vsel %vm1997_vm3, %v616_v6, %v612_v43 }
  0xcb   :  { %v1994_v45 = vpop.eup %1555  ;;  %1561 = vrcp.f32 %v2002_v14  ;;  %v2023_v27 = vadd.f32 1.0, %v1554_v5  ;;  %vm2071_vm13 = vcmp.eq.f32.partialorder %v628_v39, 8.507059e+37  ;;  %v750_v59 = vand.u32 2147483648, %v1974_v54  ;;  %v387_v36 = vpop.f32.mrf.mxu2 }
  0xcc   :  { %v620_v20 = vmul.f32 %v1994_v45, %v1972_v53  ;;  %v2014_v21 = vpop.eup %1557  ;;  %v847_v24 = vmul.f32 %v1977_v56, %v846_v44  ;;  %v966_v37 = vsub.f32 1.0, %v965_v17  ;;  %v737_v61 = vsel %vm2004_vm4, %v736_v30, %v732_v33  ;;  %v2162_v33 = vld [vmem:[#allocation7 + $0x8] sm:$0xff] }
  0xcd   :  { %v740_v26 = vmul.f32 %v2014_v21, %v1974_v54  ;;  %v1560_v40 = vpop.eup %1559  ;;  %1563 = vrcp.f32 %v2023_v27  ;;  %vm744_vm15 = vweird.f32 %v1974_v54  ;;  %v748_v63 = vand.u32 2147483647, %v1974_v54 }
  0xce   :  { %v621_v25 = vsub.f32 1.0, %v620_v20  ;;  %v848_v47 = vadd.f32 %v1977_v56, %v847_v24  ;;  %v2064_v7 = vadd.f32 1.0, %v1560_v40  ;;  %1565 = vpow2.f32 %v1447_v34 }
  0xcf   :  { %v741_v50 = vsub.f32 1.0, %v740_v26  ;;  %v967_v57 = vmul.f32 %v1986_v2, %v966_v37  ;;  %vm625_vm0 = vweird.f32 %v1994_v45  ;;  %v2098_v4 = vmul.f32 %v2068_v55, %v617_v52  ;;  %v367_v26 = vpop.f32.mrf.mxu1 }
  0xd0   :  { %v622_v49 = vmul.f32 %v1994_v45, %v621_v25  ;;  %1567 = vrcp.f32 %v2064_v7  ;;  %v852_v1 = vsel %vm2084_vm14, %v1977_v56, %v848_v47  ;;  %vm970_vm1 = vweird.f32 %v1986_v2  ;;  %vm2117_vm2 = vmor %vm624_vm12, %vm625_vm0 }
  0xd1   :  { %v2060_v51 = vpop.eup %1561  ;;  %v742_v41 = vmul.f32 %v2014_v21, %v741_v50  ;;  %v1455_v6 = vmul.f32 -1.442695, %v462_v11  ;;  %v2104_v44 = vmul.f32 %v2068_v55, %v737_v61  ;;  %v2107_v56 = vadd.f32 %v1986_v2, %v967_v57  ;;  %vm2141_vm6 = vmor %vm969_vm11, %vm970_vm1  ;;  %v407_v62 = vpop.f32.mrf.mxu3 }
  0xd2   :  { %v860_v60 = vmul.f32 %v2060_v51, %v2002_v14  ;;  %v623_v3 = vadd.f32 %v1994_v45, %v622_v49  ;;  %v631_v9 = vor.u32 1.1754944e-38, %v630_v42  ;;  %v751_v12 = vor.u32 1.1754944e-38, %v750_v59 }
  0xd3   :  { %v2101_v8 = vpop.eup %1563  ;;  %v857_v17 = vsel %vm2041_vm9, %v856_v31, %v852_v1  ;;  %vm2121_vm3 = vcmp.eq.f32.partialorder %v748_v63, 8.507059e+37  ;;  %vm864_vm4 = vweird.f32 %v2002_v14  ;;  %v868_v22 = vand.u32 2147483647, %v2002_v14 }
  0xd4   :  { %v861_v5 = vsub.f32 1.0, %v860_v60  ;;  %v1566_v16 = vpop.eup %1565  ;;  %v870_v23 = vand.u32 2147483648, %v2002_v14  ;;  %1569 = vpow2.f32 %v1455_v6  ;;  %v627_v24 = vsel %vm2117_vm2, %v1994_v45, %v623_v3  ;;  %v2363_v6 = vld [vmem:[#allocation7 + $0x18] sm:$0xff] }
  0xd5   :  { %v743_v53 = vadd.f32 %v2014_v21, %v742_v41  ;;  %vm745_vm5 = vweird.f32 %v2014_v21  ;;  %v2133_v25 = vadd.f32 1.0, %v1566_v16  ;;  %v980_v45 = vmul.f32 %v2101_v8, %v2023_v27 }
  0xd6   :  { %v2135_v28 = vpop.eup %1567  ;;  %v862_v30 = vmul.f32 %v2060_v51, %v861_v5  ;;  %v470_v34 = vadd.f32 %v1965_v48, %v405_v0  ;;  %v447_v35 = vadd.f32 %v2109_v13, %v347_v15  ;;  %v2151_v31 = vmul.f32 %v2068_v55, %v857_v17  ;;  %vm2168_vm7 = vmor %vm744_vm15, %vm745_vm5 }
  0xd7   :  { %v972_v37 = vsel %vm2141_vm6, %v1986_v2, %v2107_v56  ;;  %v990_v39 = vand.u32 2147483648, %v2023_v27  ;;  %v635_v40 = vmul.f32 %v2135_v28, %v2064_v7  ;;  %v632_v43 = vsel %vm2071_vm13, %v631_v9, %v627_v24 }
  0xd8   :  { %vm2172_vm8 = vcmp.eq.f32.partialorder %v868_v22, 8.507059e+37  ;;  %v871_v49 = vor.u32 1.1754944e-38, %v870_v23  ;;  %1571 = vrcp.f32 %v2133_v25  ;;  %v455_v50 = vadd.f32 %v2109_v13, %v367_v26  ;;  %v350_v23 = vpop.f32.mrf.mxu0 }
  0xd9   :  { %v747_v42 = vsel %vm2168_vm7, %v2014_v21, %v743_v53  ;;  %vm865_vm9 = vweird.f32 %v2060_v51  ;;  %v636_v54 = vsub.f32 1.0, %v635_v40  ;;  %v463_v52 = vadd.f32 %v2109_v13, %v387_v36 }
  0xda   :  { %v1570_v57 = vpop.eup %1569  ;;  %v863_v58 = vadd.f32 %v2060_v51, %v862_v30  ;;  %v981_v59 = vsub.f32 1.0, %v980_v45  ;;  %v1463_v60 = vmul.f32 -1.442695, %v470_v34  ;;  %v1440_v61 = vmul.f32 -1.442695, %v447_v35  ;;  %vm2198_vm11 = vmor %vm864_vm4, %vm865_vm9 }
  0xdb   :  { %v1089_v63 = vmul.f32 %v2162_v33, %v632_v43  ;;  %v988_v0 = vand.u32 2147483647, %v2023_v27  ;;  %v2186_v1 = vor.u32 1.1754944e-38, %v990_v39  ;;  %v637_v21 = vmul.f32 %v2135_v28, %v636_v54 }
  0xdc   :  { %vm639_vm10 = vweird.f32 %v2064_v7  ;;  %v2190_v3 = vadd.f32 1.0, %v1570_v57  ;;  %1573 = vpow2.f32 %v1463_v60  ;;  %v1448_v41 = vmul.f32 -1.442695, %v455_v50 }
  0xdd   :  { %v752_v5 = vsel %vm2121_vm3, %v751_v12, %v747_v42  ;;  %vm984_vm12 = vweird.f32 %v2023_v27  ;;  %1575 = vpow2.f32 %v1440_v61  ;;  %v1456_v9 = vmul.f32 -1.442695, %v463_v52 }
  0xde   :  { %v471_v15 = vadd.f32 %v2109_v13, %v407_v62  ;;  %v2204_v16 = vpop.eup %1571  ;;  %v867_v12 = vsel %vm2198_vm11, %v2060_v51, %v863_v58  ;;  %v982_v17 = vmul.f32 %v2101_v8, %v981_v59  ;;  %v643_v14 = vand.u32 2147483647, %v2064_v7  ;;  %v2273_v62 = vld [vmem:[#allocation7 + $0x10] sm:$0xff] }
  0xdf   :  { %1577 = vrcp.f32 %v2190_v3  ;;  %v638_v19 = vadd.f32 %v2135_v28, %v637_v21  ;;  %vm640_vm13 = vweird.f32 %v2135_v28  ;;  %v645_v20 = vand.u32 2147483648, %v2064_v7 }
  0xe0   :  { %v755_v22 = vmul.f32 %v2204_v16, %v2133_v25  ;;  %v2218_v24 = vadd.f32 %v1089_v63, %v2098_v4  ;;  %v1097_v51 = vmul.f32 %v2162_v33, %v752_v5  ;;  %vm985_vm14 = vweird.f32 %v2101_v8  ;;  %vm2233_vm0 = vmor %vm639_vm10, %vm640_vm13 }
  0xe1   :  { %1579 = vpow2.f32 %v1448_v41  ;;  %v872_v53 = vsel %vm2172_vm8, %v871_v49, %v867_v12  ;;  %vm2224_vm15 = vcmp.eq.f32.partialorder %v988_v0, 8.507059e+37  ;;  %v1464_v45 = vmul.f32 -1.442695, %v471_v15  ;;  %vm2267_vm3 = vmor %vm984_vm12, %vm985_vm14  ;;  %v370_v41 = vpop.f32.mrf.mxu1 }
  0xe2   :  { %v756_v30 = vsub.f32 1.0, %v755_v22  ;;  %1581 = vpow2.f32 %v1456_v9  ;;  %v1574_v34 = vpop.eup %1573  ;;  %v983_v35 = vadd.f32 %v2101_v8, %v982_v17  ;;  %vm2237_vm1 = vcmp.eq.f32.partialorder %v643_v14, 8.507059e+37 }
  0xe3   :  { %v763_v39 = vand.u32 2147483647, %v2133_v25  ;;  %v448_v40 = vadd.f32 %v1938_v10, %v350_v23  ;;  %v1576_v43 = vpop.eup %1575  ;;  %v642_v11 = vsel %vm2233_vm0, %v2135_v28, %v638_v19  ;;  %v2247_v7 = vadd.f32 1.0, %v1574_v34 }
  0xe4   :  { %v757_v47 = vmul.f32 %v2204_v16, %v756_v30  ;;  %1583 = vpow2.f32 %v1464_v45  ;;  %v1105_v50 = vmul.f32 %v2162_v33, %v872_v53  ;;  %v646_v42 = vor.u32 1.1754944e-38, %v645_v20 }
  0xe5   :  { %v2249_v49 = vpop.eup %1577  ;;  %v765_v54 = vand.u32 2147483648, %v2133_v25  ;;  %v2253_v52 = vadd.f32 1.0, %v1576_v43  ;;  %vm760_vm2 = vweird.f32 %v2204_v16  ;;  %1585 = vrcp.f32 %v2247_v7 }
  0xe6   :  { %v758_v57 = vadd.f32 %v2204_v16, %v757_v47  ;;  %v875_v28 = vmul.f32 %v2249_v49, %v2190_v3  ;;  %v2261_v59 = vadd.f32 %v1097_v51, %v2104_v44  ;;  %v647_v61 = vsel %vm2237_vm1, %v646_v42, %v642_v11 }
  0xe7   :  { %v1580_v58 = vpop.eup %1579  ;;  %1587 = vrcp.f32 %v2253_v52  ;;  %v1441_v63 = vmul.f32 -1.442695, %v448_v40  ;;  %v987_v44 = vsel %vm2267_vm3, %v2101_v8, %v983_v35  ;;  %vm759_vm4 = vweird.f32 %v2133_v25 }
  0xe8   :  { %v1582_v0 = vpop.eup %1581  ;;  %vm2280_vm5 = vcmp.eq.f32.partialorder %v763_v39, 8.507059e+37  ;;  %v876_v21 = vsub.f32 1.0, %v875_v28  ;;  %v2285_v5 = vadd.f32 %v1105_v50, %v2151_v31  ;;  %vm2289_vm7 = vmor %vm759_vm4, %vm760_vm2  ;;  %v766_v9 = vor.u32 1.1754944e-38, %v765_v54 }
  0xe9   :  { %v883_v8 = vand.u32 2147483647, %v2190_v3  ;;  %v885_v25 = vand.u32 2147483648, %v2190_v3  ;;  %v1090_v12 = vmul.f32 %v2273_v62, %v647_v61  ;;  %v762_v17 = vsel %vm2289_vm7, %v2204_v16, %v758_v57  ;;  %v352_v16 = vpop.f32.mrf.mxu0 }
  0xea   :  { %v1584_v15 = vpop.eup %1583  ;;  %v877_v31 = vmul.f32 %v2249_v49, %v876_v21  ;;  %v2300_v14 = vadd.f32 1.0, %v1580_v58  ;;  %v2305_v19 = vsel %vm2224_vm15, %v2186_v1, %v987_v44  ;;  %v2307_v20 = vadd.f32 1.0, %v1582_v0 }
  0xeb   :  { %1589 = vpow2.f32 %v1441_v63  ;;  %v456_v22 = vadd.f32 %v1938_v10, %v370_v41  ;;  %v2310_v23 = vpop.eup %1585  ;;  %vm879_vm8 = vweird.f32 %v2190_v3  ;;  %vm880_vm9 = vweird.f32 %v2249_v49  ;;  %v410_v63 = vpop.f32.mrf.mxu3 }
  0xec   :  { %v878_v51 = vadd.f32 %v2249_v49, %v877_v31  ;;  %1591 = vrcp.f32 %v2300_v14  ;;  %v767_v1 = vsel %vm2280_vm5, %v766_v9, %v762_v17  ;;  %vm2318_vm10 = vcmp.eq.f32.partialorder %v883_v8, 8.507059e+37  ;;  %vm2329_vm11 = vmor %vm879_vm8, %vm880_vm9 }
  0xed   :  { %v1588_v53 = vpop.eup %1587  ;;  %v886_v30 = vor.u32 1.1754944e-38, %v885_v25  ;;  %v2322_v45 = vadd.f32 1.0, %v1584_v15  ;;  %v1121_v34 = vadd.f32 %v2218_v24, %v1090_v12  ;;  %v995_v3 = vmul.f32 %v2310_v23, %v2247_v7 }
  0xee   :  { %v650_v35 = vmul.f32 %v1588_v53, %v2253_v52  ;;  %1593 = vrcp.f32 %v2307_v20  ;;  %v658_v36 = vand.u32 2147483647, %v2253_v52  ;;  %v660_v39 = vand.u32 2147483648, %v2253_v52 }
  0xef   :  { %v2335_v40 = vmul.f32 -1.442695, %v456_v22  ;;  %v2338_v43 = vadd.f32 %v1942_v18, %v352_v16  ;;  %v1098_v24 = vmul.f32 %v2273_v62, %v767_v1  ;;  %v882_v11 = vsel %vm2329_vm11, %v2249_v49, %v878_v51 }
  0xf0   :  { %v1003_v47 = vand.u32 2147483647, %v2247_v7  ;;  %v651_v50 = vsub.f32 1.0, %v650_v35  ;;  %v1005_v54 = vand.u32 2147483648, %v2247_v7  ;;  %vm654_vm12 = vweird.f32 %v2253_v52  ;;  %v372_v52 = vpop.f32.mrf.mxu1 }
  0xf1   :  { %v1590_v42 = vpop.eup %1589  ;;  %v778_v57 = vand.u32 2147483647, %v2300_v14  ;;  %1595 = vrcp.f32 %v2322_v45  ;;  %v996_v58 = vsub.f32 1.0, %v995_v3  ;;  %vm655_vm13 = vweird.f32 %v1588_v53 }
  0xf2   :  { %v1592_v28 = vpop.eup %1591  ;;  %v652_v60 = vmul.f32 %v1588_v53, %v651_v50  ;;  %v780_v61 = vand.u32 2147483648, %v2300_v14  ;;  %v887_v49 = vsel %vm2318_vm10, %v886_v30, %v882_v11  ;;  %vm2352_vm14 = vcmp.eq.f32.partialorder %v658_v36, 8.507059e+37  ;;  %vm656_vm2 = vmor %vm654_vm12, %vm655_vm13 }
  0xf3   :  { %v661_v0 = vor.u32 1.1754944e-38, %v660_v39  ;;  %v770_v44 = vmul.f32 %v1592_v28, %v2300_v14  ;;  %v1139_v21 = vadd.f32 %v2261_v59, %v1098_v24  ;;  %vm1000_vm15 = vweird.f32 %v2310_v23 }
  0xf4   :  { %v1594_v27 = vpop.eup %1593  ;;  %v653_v41 = vadd.f32 %v1588_v53, %v652_v60  ;;  %vm774_vm0 = vweird.f32 %v2300_v14  ;;  %vm999_vm1 = vweird.f32 %v2247_v7  ;;  %vm2365_vm3 = vcmp.eq.f32.partialorder %v778_v57, 8.507059e+37 }
  0xf5   :  { %v771_v9 = vsub.f32 1.0, %v770_v44  ;;  %v890_v25 = vmul.f32 %v1594_v27, %v2307_v20  ;;  %v2370_v59 = vadd.f32 1.0, %v1590_v42  ;;  %v1106_v15 = vmul.f32 %v2273_v62, %v887_v49 }
  0xf6   :  { %v997_v12 = vmul.f32 %v2310_v23, %v996_v58  ;;  %v657_v17 = vsel %vm656_vm2, %v1588_v53, %v653_v41  ;;  %v781_v31 = vor.u32 1.1754944e-38, %v780_v61  ;;  %vm2378_vm4 = vcmp.eq.f32.partialorder %v973_v32, 8.507059e+37  ;;  %v390_v58 = vpop.f32.mrf.mxu2 }
  0xf7   :  { %v2374_v22 = vpop.eup %1595  ;;  %v662_v51 = vsel %vm2352_vm14, %v661_v0, %v657_v17  ;;  %v772_v16 = vmul.f32 %v1592_v28, %v771_v9  ;;  %vm775_vm5 = vweird.f32 %v1592_v28  ;;  %v891_v1 = vsub.f32 1.0, %v890_v25  ;;  %vm2405_vm14 = vmor %vm999_vm1, %vm1000_vm15 }
  0xf8   :  { %v1091_v26 = vmul.f32 %v2363_v6, %v662_v51  ;;  %v898_v30 = vand.u32 2147483647, %v2307_v20  ;;  %v900_v53 = vand.u32 2147483648, %v2307_v20  ;;  %v1010_v3 = vmul.f32 %v2374_v22, %v2322_v45  ;;  %vm776_vm8 = vmor %vm774_vm0, %vm775_vm5 }
  0xf9   :  { %v773_v46 = vadd.f32 %v1592_v28, %v772_v16  ;;  %v892_v32 = vmul.f32 %v1594_v27, %v891_v1  ;;  %vm895_vm7 = vweird.f32 %v1594_v27  ;;  %1597 = vrcp.f32 %v2370_v59 }
  0xfa   :  { %v1122_v35 = vadd.f32 %v1121_v34, %v1091_v26  ;;  %vm894_vm9 = vweird.f32 %v2307_v20  ;;  %v1011_v4 = vsub.f32 1.0, %v1010_v3  ;;  %vm1014_vm10 = vweird.f32 %v2322_v45 }
  0xfb   :  { %v1157_v36 = vadd.f32 %v2285_v5, %v1106_v15  ;;  %v998_v39 = vadd.f32 %v2310_v23, %v997_v12  ;;  %v777_v24 = vsel %vm776_vm8, %v1592_v28, %v773_v46  ;;  %v893_v11 = vadd.f32 %v1594_v27, %v892_v32  ;;  %vm896_vm11 = vmor %vm894_vm9, %vm895_vm7 }
  0xfc   :  { %v1123_v50 = vrot.slane %v1122_v35, 4  ;;  %v782_v42 = vsel %vm2365_vm3, %v781_v31, %v777_v24  ;;  %v901_v34 = vor.u32 1.1754944e-38, %v900_v53  ;;  %v1012_v14 = vmul.f32 %v2374_v22, %v1011_v4 }
  0xfd   :  { %v1099_v57 = vmul.f32 %v2363_v6, %v782_v42  ;;  %v897_v20 = vsel %vm896_vm11, %v1594_v27, %v893_v11  ;;  %vm899_vm12 = vcmp.eq.f32.partialorder %v898_v30, 8.507059e+37  ;;  %vm1015_vm13 = vweird.f32 %v2374_v22 }
  0xfe   :  { %v902_v28 = vsel %vm899_vm12, %v901_v34, %v897_v20  ;;  %v1013_v60 = vadd.f32 %v2374_v22, %v1012_v14  ;;  %v1018_v61 = vand.u32 2147483647, %v2322_v45  ;;  %v1020_v49 = vand.u32 2147483648, %v2322_v45  ;;  %vm2434_vm15 = vmor %vm1014_vm10, %vm1015_vm13 }
  0xff   :  { %v2412_v0 = vpop.eup %1597  ;;  %v1002_v44 = vsel %vm2405_vm14, %v2310_v23, %v998_v39  ;;  %v1124_v27 = vadd.f32 %v1123_v50, %v1122_v35  ;;  %v1140_v41 = vadd.f32 %v1139_v21, %v1099_v57  ;;  %v1107_v9 = vmul.f32 %v2363_v6, %v902_v28  ;;  %v2461_v57 = vld [vmem:[%s3035_s4] ss:$0 sm:$0xff]  ;;  %s1805_s4 = smov [#allocation8]  }
 0x100   :  { %v977_v8 = vsel %vm2378_vm4, %v2045_v38, %v972_v37  ;;  %v1113_v25 = vmul.f32 %v2162_v33, %v2305_v19  ;;  %v1006_v15 = vor.u32 1.1754944e-38, %v1005_v54  ;;  %v464_v2 = vadd.f32 %v1938_v10, %v390_v58  ;;  %s1392_s7 = sshll.u32 %s1805_s4, 4  ;;  %s1393_s7 = int_to_ptr.vmem [resolvable:$true] %s1392_s7 }
 0x101   :  { %vm1004_vm6 = vcmp.eq.f32.partialorder %v1003_v47, 8.507059e+37  ;;  %v1158_v38 = vadd.f32 %v1157_v36, %v1107_v9  ;;  %v1017_v56 = vsel %vm2434_vm15, %v2374_v22, %v1013_v60  ;;  %v472_v29 = vadd.f32 %v1938_v10, %v410_v63  ;;  %v392_v63 = vpop.f32.mrf.mxu2 }
 0x102   :  { %v1007_v37 = vsel %vm1004_vm6, %v1006_v15, %v1002_v44  ;;  %v1021_v19 = vor.u32 1.1754944e-38, %v1020_v49  ;;  %v665_v45 = vmul.f32 %v2412_v0, %v2370_v59  ;;  %1599 = vpow2.f32 %v2335_v40 }
 0x103   :  { %v1125_v54 = vrot.slane %v1124_v27, 2  ;;  %v1141_v21 = vrot.slane %v1140_v41, 4  ;;  %vm1019_vm0 = vcmp.eq.f32.partialorder %v1018_v61, 8.507059e+37  ;;  %v1442_v7 = vmul.f32 -1.442695, %v2338_v43 }
 0x104   :  { %v1112_v47 = vmul.f32 %v2068_v55, %v977_v8  ;;  %v1022_v12 = vsel %vm1019_vm0, %v1021_v19, %v1017_v56  ;;  %v1457_v17 = vmul.f32 -1.442695, %v464_v2  ;;  %v1114_v31 = vmul.f32 %v2273_v62, %v1007_v37  ;;  %v412_v2 = vpop.f32.mrf.mxu3 }
 0x105   :  { %v1159_v22 = vrot.slane %v1158_v38, 4  ;;  %v1465_v10 = vmul.f32 -1.442695, %v472_v29  ;;  %v666_v16 = vsub.f32 1.0, %v665_v45  ;;  %v1126_v1 = vadd.f32 %v1125_v54, %v1124_v27 }
 0x106   :  { %v1174_v51 = vadd.f32 %v1113_v25, %v1112_v47  ;;  %v1142_v26 = vadd.f32 %v1141_v21, %v1140_v41  ;;  %v1115_v40 = vmul.f32 %v2363_v6, %v1022_v12  ;;  %1601 = vpow2.f32 %v1442_v7 }
 0x107   :  { %1603 = vpow2.f32 %v1457_v17  ;;  %v457_v43 = vadd.f32 %v1942_v18, %v372_v52  ;;  %v1160_v3 = vadd.f32 %v1159_v22, %v1158_v38  ;;  %v667_v46 = vmul.f32 %v2412_v0, %v666_v16  ;;  %v355_v38 = vpop.f32.mrf.mxu0 }
 0x108   :  { %v1600_v30 = vpop.eup %1599  ;;  %v1175_v53 = vadd.f32 %v1174_v51, %v1114_v31  ;;  %1605 = vpow2.f32 %v1465_v10  ;;  %v1127_v32 = vrot.slane %v1126_v1, 1  ;;  %v1143_v35 = vrot.slane %v1142_v26, 2 }
 0x109   :  { %v2454_v36 = vadd.f32 1.0, %v1600_v30  ;;  %v1450_v39 = vmul.f32 -1.442695, %v457_v43  ;;  %v1161_v11 = vrot.slane %v1160_v3, 2  ;;  %v668_v42 = vadd.f32 %v2412_v0, %v667_v46 }
 0x10a   :  { %v1176_v4 = vadd.f32 %v1175_v53, %v1115_v40  ;;  %vm670_vm1 = vweird.f32 %v2412_v0  ;;  %v1128_v14 = vadd.f32 %v1127_v32, %v1126_v1  ;;  %v1144_v20 = vadd.f32 %v1143_v35, %v1142_v26  ;;  %v395_v26 = vpop.f32.mrf.mxu2 }
 0x10b   :  { %1607 = vrcp.f32 %v2454_v36  ;;  %v675_v5 = vand.u32 2147483648, %v2370_v59  ;;  %v1162_v60 = vadd.f32 %v1161_v11, %v1160_v3  ;;  %vm669_vm2 = vweird.f32 %v2370_v59 }
 0x10c   :  { %v1602_v24 = vpop.eup %1601  ;;  %v1177_v58 = vrot.slane %v1176_v4, 4  ;;  %1609 = vpow2.f32 %v1450_v39  ;;  %v673_v61 = vand.u32 2147483647, %v2370_v59  ;;  %vm2473_vm3 = vmor %vm669_vm2, %vm670_vm1  ;;  %v1196_v41 = vadd.f32 %v2461_v57, %v1128_v14 }
 0x10d   :  { %v1604_v50 = vpop.eup %1603  ;;  %v2465_v28 = vadd.f32 1.0, %v1602_v24  ;;  %v1145_v9 = vrot.slane %v1144_v20, 1  ;;  %v672_v25 = vsel %vm2473_vm3, %v2412_v0, %v668_v42  ;;  %v676_v59 = vor.u32 1.1754944e-38, %v675_v5 }
 0x10e   :  { %v1606_v34 = vpop.eup %1605  ;;  %v2469_v49 = vadd.f32 1.0, %v1604_v50  ;;  %v1178_v8 = vadd.f32 %v1177_v58, %v1176_v4  ;;  %v1163_v23 = vrot.slane %v1162_v60, 1  ;;  %vm674_vm4 = vcmp.eq.f32.partialorder %v673_v61, 8.507059e+37 }
 0x10f   :  { %v2477_v27 = vadd.f32 1.0, %v1606_v34  ;;  %1611 = vrcp.f32 %v2465_v28  ;;  %v677_v29 = vsel %vm674_vm4, %v676_v59, %v672_v25  ;;  %v465_v37 = vadd.f32 %v1942_v18, %v392_v63  ;;  %v357_v34 = vpop.f32.mrf.mxu0 }
 0x110   :  { %1613 = vrcp.f32 %v2469_v49  ;;  %v1469_v19 = vmul.f32 -1.442695, %v1196_v41  ;;  %v1146_v45 = vadd.f32 %v1145_v9, %v1144_v20  ;;  %v1179_v0 = vrot.slane %v1178_v8, 2 }
 0x111   :  { %v2484_v15 = vpop.eup %1607  ;;  %1615 = vrcp.f32 %v2477_v27  ;;  %v1458_v7 = vmul.f32 -1.442695, %v465_v37  ;;  %v473_v47 = vadd.f32 %v1942_v18, %v412_v2  ;;  %v450_v12 = vadd.f32 %v1965_v48, %v355_v38  ;;  %v375_v18 = vpop.f32.mrf.mxu1 }
 0x112   :  { %v1610_v56 = vpop.eup %1609  ;;  %v785_v21 = vmul.f32 %v2484_v15, %v2454_v36  ;;  %v1164_v17 = vadd.f32 %v1163_v23, %v1162_v60  ;;  %v795_v31 = vand.u32 2147483648, %v2454_v36  ;;  %v793_v10 = vand.u32 2147483647, %v2454_v36  ;;  %v415_v60 = vpop.f32.mrf.mxu3 }
 0x113   :  { %v2489_v54 = vadd.f32 1.0, %v1610_v56  ;;  %v1198_v51 = vadd.f32 %v2461_v57, %v1146_v45  ;;  %v1180_v16 = vadd.f32 %v1179_v0, %v1178_v8  ;;  %v2504_v1 = vmul.f32 %v2068_v55, %v677_v29  ;;  %v397_v2 = vpop.f32.mrf.mxu2 }
 0x114   :  { %v786_v30 = vsub.f32 1.0, %v785_v21  ;;  %v1466_v43 = vmul.f32 -1.442695, %v473_v47  ;;  %v1443_v53 = vmul.f32 -1.442695, %v450_v12  ;;  %v1200_v3 = vadd.f32 %v2461_v57, %v1164_v17 }
 0x115   :  { %1617 = vrcp.f32 %v2489_v54  ;;  %v2497_v22 = vpop.eup %1611  ;;  %v2509_v46 = vor.u32 1.1754944e-38, %v795_v31  ;;  %v915_v32 = vand.u32 2147483648, %v2469_v49  ;;  %vm789_vm5 = vweird.f32 %v2454_v36 }
 0x116   :  { %v2500_v52 = vpop.eup %1613  ;;  %1619 = vpow2.f32 %v1469_v19  ;;  %v680_v35 = vmul.f32 %v2497_v22, %v2465_v28  ;;  %v458_v39 = vadd.f32 %v1965_v48, %v375_v18  ;;  %v466_v24 = vadd.f32 %v1965_v48, %v395_v26 }
 0x117   :  { %v2506_v40 = vpop.eup %1615  ;;  %1621 = vpow2.f32 %v1458_v7  ;;  %v905_v4 = vmul.f32 %v2500_v52, %v2469_v49  ;;  %vm790_vm7 = vweird.f32 %v2484_v15  ;;  %v913_v50 = vand.u32 2147483647, %v2469_v49 }
 0x118   :  { %1623 = vpow2.f32 %v1466_v43  ;;  %v1025_v42 = vmul.f32 %v2506_v40, %v2477_v27  ;;  %v1471_v14 = vmul.f32 -1.442695, %v1198_v51  ;;  %v1181_v20 = vrot.slane %v1180_v16, 1  ;;  %vm2555_vm11 = vmor %vm789_vm5, %vm790_vm7 }
 0x119   :  { %1625 = vpow2.f32 %v1443_v53  ;;  %v787_v58 = vmul.f32 %v2484_v15, %v786_v30  ;;  %v1451_v5 = vmul.f32 -1.442695, %v458_v39  ;;  %v1473_v63 = vmul.f32 -1.442695, %v1200_v3 }
 0x11a   :  { %v2526_v44 = vor.u32 1.1754944e-38, %v915_v32  ;;  %v681_v41 = vsub.f32 1.0, %v680_v35  ;;  %v906_v25 = vsub.f32 1.0, %v905_v4  ;;  %v1459_v59 = vmul.f32 -1.442695, %v466_v24 }
 0x11b   :  { %v2519_v11 = vpop.eup %1617  ;;  %1627 = vpow2.f32 %v1451_v5  ;;  %v451_v23 = vadd.f32 %v2109_v13, %v357_v34  ;;  %vm2531_vm8 = vcmp.eq.f32.partialorder %v793_v10, 8.507059e+37  ;;  %v1026_v38 = vsub.f32 1.0, %v1025_v42 }
 0x11c   :  { %v1620_v61 = vpop.eup %1619  ;;  %v800_v9 = vmul.f32 %v2519_v11, %v2489_v54  ;;  %v1033_v56 = vand.u32 2147483647, %v2477_v27  ;;  %v474_v37 = vadd.f32 %v1965_v48, %v415_v60  ;;  %1629 = vpow2.f32 %v1471_v14 }
 0x11d   :  { %v1622_v8 = vpop.eup %1621  ;;  %v2539_v45 = vadd.f32 1.0, %v1620_v61  ;;  %v2541_v0 = vadd.f32 %v1181_v20, %v1180_v16  ;;  %v788_v21 = vadd.f32 %v2484_v15, %v787_v58  ;;  %vm909_vm9 = vweird.f32 %v2469_v49 }
 0x11e   :  { %v2536_v29 = vadd.f32 1.0, %v1622_v8  ;;  %v1624_v19 = vpop.eup %1623  ;;  %1631 = vpow2.f32 %v1473_v63  ;;  %vm1029_vm10 = vweird.f32 %v2477_v27  ;;  %v1035_v47 = vand.u32 2147483648, %v2477_v27 }
 0x11f   :  { %v1626_v7 = vpop.eup %1625  ;;  %v682_v12 = vmul.f32 %v2497_v22, %v681_v41  ;;  %v801_v17 = vsub.f32 1.0, %v800_v9  ;;  %v907_v48 = vmul.f32 %v2500_v52, %v906_v25  ;;  %1633 = vpow2.f32 %v1459_v59 }
 0x120   :  { %v2549_v31 = vadd.f32 1.0, %v1626_v7  ;;  %v1444_v10 = vmul.f32 -1.442695, %v451_v23  ;;  %vm910_vm12 = vweird.f32 %v2500_v52  ;;  %v1027_v16 = vmul.f32 %v2506_v40, %v1026_v38 }
 0x121   :  { %1635 = vrcp.f32 %v2536_v29  ;;  %v1467_v18 = vmul.f32 -1.442695, %v474_v37  ;;  %v1628_v26 = vpop.eup %1627  ;;  %v792_v30 = vsel %vm2555_vm11, %v2484_v15, %v788_v21  ;;  %vm2566_vm13 = vcmp.eq.f32.partialorder %v913_v50, 8.507059e+37  ;;  %v377_v15 = vpop.f32.mrf.mxu1  ;;  %vm2607_vm2 = vmor %vm909_vm9, %vm910_vm12 }
 0x122   :  { %1637 = vrcp.f32 %v2539_v45  ;;  %v688_v43 = vand.u32 2147483647, %v2465_v28  ;;  %v2571_v53 = vadd.f32 1.0, %v1624_v19  ;;  %vm2573_vm14 = vcmp.eq.f32.partialorder %v1033_v56, 8.507059e+37  ;;  %v1630_v4 = vpop.eup %1629 }
 0x123   :  { %v683_v32 = vadd.f32 %v2497_v22, %v682_v12  ;;  %vm685_vm15 = vweird.f32 %v2497_v22  ;;  %v802_v35 = vmul.f32 %v2519_v11, %v801_v17  ;;  %1639 = vrcp.f32 %v2549_v31 }
 0x124   :  { %v908_v39 = vadd.f32 %v2500_v52, %v907_v48  ;;  %vm1030_vm6 = vweird.f32 %v2506_v40  ;;  %v690_v24 = vand.u32 2147483648, %v2465_v28  ;;  %1641 = vpow2.f32 %v1444_v10  ;;  %v2584_v50 = vpop.eup %1631 }
 0x125   :  { %v1028_v42 = vadd.f32 %v2506_v40, %v1027_v16  ;;  %vm684_vm0 = vweird.f32 %v2465_v28  ;;  %v2588_v34 = vadd.f32 1.0, %v1628_v26  ;;  %1643 = vpow2.f32 %v1467_v18  ;;  %v1634_v14 = vpop.eup %1633  ;;  %vm2629_vm5 = vmor %vm1029_vm10, %vm1030_vm6  ;;  %v417_v26 = vpop.f32.mrf.mxu3 }
 0x126   :  { %v797_v20 = vsel %vm2531_vm8, %v2509_v46, %v792_v30  ;;  %v1036_v58 = vor.u32 1.1754944e-38, %v1035_v47  ;;  %vm2595_vm1 = vmor %vm684_vm0, %vm685_vm15  ;;  %1645 = vrcp.f32 %v2571_v53  ;;  %v459_v60 = vadd.f32 %v2109_v13, %v377_v15 }
 0x127   :  { %v2601_v28 = vpop.eup %1635  ;;  %v687_v46 = vsel %vm2595_vm1, %v2497_v22, %v683_v32  ;;  %vm2614_vm3 = vcmp.eq.f32.partialorder %v688_v43, 8.507059e+37  ;;  %v803_v41 = vadd.f32 %v2519_v11, %v802_v35  ;;  %vm805_vm4 = vweird.f32 %v2519_v11 }
 0x128   :  { %v2620_v9 = vpop.eup %1637  ;;  %v912_v49 = vsel %vm2607_vm2, %v2500_v52, %v908_v39  ;;  %v691_v8 = vor.u32 1.1754944e-38, %v690_v24  ;;  %v810_v25 = vand.u32 2147483648, %v2489_v54  ;;  %1647 = vrcp.f32 %v2588_v34 }
 0x129   :  { %v2635_v59 = vpop.eup %1639  ;;  %v1032_v23 = vsel %vm2629_vm5, %v2506_v40, %v1028_v42  ;;  %vm804_vm7 = vweird.f32 %v2489_v54  ;;  %v808_v52 = vand.u32 2147483647, %v2489_v54  ;;  %v2642_v27 = vadd.f32 1.0, %v1634_v14 }
 0x12a   :  { %v1642_v38 = vpop.eup %1641  ;;  %v692_v56 = vsel %vm2614_vm3, %v691_v8, %v687_v46  ;;  %vm2648_vm8 = vmor %vm804_vm7, %vm805_vm4  ;;  %v920_v40 = vmul.f32 %v2601_v28, %v2536_v29  ;;  %v695_v19 = vmul.f32 %v2635_v59, %v2549_v31  ;;  %v1452_v54 = vmul.f32 -1.442695, %v459_v60 }
 0x12b   :  { %v1644_v21 = vpop.eup %1643  ;;  %v2656_v7 = vadd.f32 1.0, %v1630_v4  ;;  %v1100_v47 = vmul.f32 %v2068_v55, %v797_v20  ;;  %v917_v12 = vsel %vm2566_vm13, %v2526_v44, %v912_v49  ;;  %v807_v17 = vsel %vm2648_vm8, %v2519_v11, %v803_v41 }
 0x12c   :  { %v2665_v48 = vpop.eup %1645  ;;  %v1037_v10 = vsel %vm2573_vm14, %v1036_v58, %v1032_v23  ;;  %v811_v51 = vor.u32 1.1754944e-38, %v810_v25  ;;  %v696_v16 = vsub.f32 1.0, %v695_v19  ;;  %v467_v18 = vadd.f32 %v2109_v13, %v397_v2 }
 0x12d   :  { %v1093_v30 = vmul.f32 %v2162_v33, %v692_v56  ;;  %vm809_vm9 = vcmp.eq.f32.partialorder %v808_v52, 8.507059e+37  ;;  %1649 = vrcp.f32 %v2642_v27  ;;  %v2672_v44 = vadd.f32 1.0, %v1642_v38 }
 0x12e   :  { %v2674_v36 = vpop.eup %1647  ;;  %v812_v11 = vsel %vm809_vm9, %v811_v51, %v807_v17  ;;  %v921_v43 = vsub.f32 1.0, %v920_v40  ;;  %v2676_v32 = vadd.f32 1.0, %v1644_v21  ;;  %1651 = vpow2.f32 %v1452_v54 }
 0x12f   :  { %v2679_v3 = vmul.f32 %v2068_v55, %v917_v12  ;;  %v2682_v35 = vmul.f32 %v2068_v55, %v1037_v10  ;;  %v1040_v15 = vmul.f32 %v2665_v48, %v2571_v53  ;;  %v475_v4 = vadd.f32 %v2109_v13, %v417_v26 }
 0x130   :  { %v928_v39 = vand.u32 2147483647, %v2536_v29  ;;  %v930_v24 = vand.u32 2147483648, %v2536_v29  ;;  %v697_v42 = vmul.f32 %v2635_v59, %v696_v16  ;;  %v1460_v14 = vmul.f32 -1.442695, %v467_v18 }
 0x131   :  { %v1101_v20 = vmul.f32 %v2162_v33, %v812_v11  ;;  %v1050_v58 = vand.u32 2147483648, %v2571_v53  ;;  %v815_v55 = vmul.f32 %v2674_v36, %v2588_v34  ;;  %1653 = vrcp.f32 %v2672_v44 }
 0x132   :  { %v2696_v5 = vadd.f32 %v1093_v30, %v2504_v1  ;;  %v922_v13 = vmul.f32 %v2601_v28, %v921_v43  ;;  %v703_v60 = vand.u32 2147483647, %v2549_v31  ;;  %1655 = vrcp.f32 %v2676_v32 }
 0x133   :  { %v2701_v61 = vpop.eup %1649  ;;  %vm924_vm10 = vweird.f32 %v2536_v29  ;;  %v1041_v33 = vsub.f32 1.0, %v1040_v15  ;;  %v705_v46 = vand.u32 2147483648, %v2549_v31  ;;  %v1468_v63 = vmul.f32 -1.442695, %v475_v4 }
 0x134   :  { %v1652_v41 = vpop.eup %1651  ;;  %vm2705_vm11 = vcmp.eq.f32.partialorder %v928_v39, 8.507059e+37  ;;  %v931_v1 = vor.u32 1.1754944e-38, %v930_v24  ;;  %v1048_v22 = vand.u32 2147483647, %v2571_v53  ;;  %v698_v8 = vadd.f32 %v2635_v59, %v697_v42 }
 0x135   :  { %vm700_vm12 = vweird.f32 %v2635_v59  ;;  %v2712_v25 = vadd.f32 %v1101_v20, %v1100_v47  ;;  %vm1044_vm13 = vweird.f32 %v2571_v53  ;;  %v2715_v23 = vor.u32 1.1754944e-38, %v1050_v58 }
 0x136   :  { %vm699_vm14 = vweird.f32 %v2549_v31  ;;  %v816_v52 = vsub.f32 1.0, %v815_v55  ;;  %v923_v2 = vadd.f32 %v2601_v28, %v922_v13  ;;  %vm925_vm15 = vweird.f32 %v2601_v28 }
 0x137   :  { %vm2720_vm6 = vcmp.eq.f32.partialorder %v703_v60, 8.507059e+37  ;;  %v935_v56 = vmul.f32 %v2701_v61, %v2642_v27  ;;  %v1654_v37 = vpop.eup %1653  ;;  %v1042_v40 = vmul.f32 %v2665_v48, %v1041_v33  ;;  %vm2727_vm0 = vmor %vm699_vm14, %vm700_vm12  ;;  %v706_v31 = vor.u32 1.1754944e-38, %v705_v46 }
 0x138   :  { %v823_v54 = vand.u32 2147483647, %v2588_v34  ;;  %v2732_v21 = vadd.f32 1.0, %v1652_v41  ;;  %v2734_v47 = vpop.eup %1655  ;;  %v702_v12 = vsel %vm2727_vm0, %v2635_v59, %v698_v8  ;;  %vm819_vm1 = vweird.f32 %v2588_v34  ;;  %vm2744_vm2 = vmor %vm924_vm10, %vm925_vm15 }
 0x139   :  { %v825_v17 = vand.u32 2147483648, %v2588_v34  ;;  %v710_v10 = vmul.f32 %v1654_v37, %v2672_v44  ;;  %vm1045_vm3 = vweird.f32 %v2665_v48  ;;  %vm2749_vm4 = vcmp.eq.f32.partialorder %v1048_v22, 8.507059e+37  ;;  %v1691_v22 = vld [vmem:[#allocation7 + $0x8] sm:$0xff] }
 0x13a   :  { %v817_v59 = vmul.f32 %v2674_v36, %v816_v52  ;;  %v943_v18 = vand.u32 2147483647, %v2642_v27  ;;  %v945_v26 = vand.u32 2147483648, %v2642_v27  ;;  %v927_v29 = vsel %vm2744_vm2, %v2601_v28, %v923_v2  ;;  %vm2780_vm10 = vmor %vm1044_vm13, %vm1045_vm3 }
 0x13b   :  { %v936_v30 = vsub.f32 1.0, %v935_v56  ;;  %v711_v11 = vsub.f32 1.0, %v710_v10  ;;  %1657 = vrcp.f32 %v2732_v21  ;;  %v1043_v43 = vadd.f32 %v2665_v48, %v1042_v40 }
 0x13c   :  { %v707_v15 = vsel %vm2720_vm6, %v706_v31, %v702_v12  ;;  %vm2763_vm5 = vcmp.eq.f32.partialorder %v823_v54, 8.507059e+37  ;;  %v1055_v39 = vmul.f32 %v2734_v47, %v2676_v32  ;;  %v720_v24 = vand.u32 2147483648, %v2672_v44 }
 0x13d   :  { %vm939_vm7 = vweird.f32 %v2642_v27  ;;  %v712_v28 = vmul.f32 %v1654_v37, %v711_v11  ;;  %vm715_vm8 = vweird.f32 %v1654_v37  ;;  %v718_v42 = vand.u32 2147483647, %v2672_v44 }
 0x13e   :  { %1659 = vpow2.f32 %v1460_v14  ;;  %v932_v20 = vsel %vm2705_vm11, %v931_v1, %v927_v29  ;;  %v818_v58 = vadd.f32 %v2674_v36, %v817_v59  ;;  %vm820_vm9 = vweird.f32 %v2674_v36 }
 0x13f   :  { %1661 = vpow2.f32 %v1468_v63  ;;  %v1094_v13 = vmul.f32 %v2273_v62, %v707_v15  ;;  %v937_v14 = vmul.f32 %v2701_v61, %v936_v30  ;;  %v713_v60 = vadd.f32 %v1654_v37, %v712_v28  ;;  %vm2793_vm13 = vmor %vm819_vm1, %vm820_vm9 }
 0x140   :  { %vm714_vm11 = vweird.f32 %v2672_v44  ;;  %v1047_v33 = vsel %vm2780_vm10, %v2665_v48, %v1043_v43  ;;  %v826_v46 = vor.u32 1.1754944e-38, %v825_v17  ;;  %v1056_v63 = vsub.f32 1.0, %v1055_v39 }
 0x141   :  { %vm716_vm12 = vmor %vm714_vm11, %vm715_vm8  ;;  %v721_v53 = vor.u32 1.1754944e-38, %v720_v24  ;;  %v1658_v41 = vpop.eup %1657  ;;  %vm940_vm14 = vweird.f32 %v2701_v61  ;;  %v946_v1 = vor.u32 1.1754944e-38, %v945_v26  ;;  %vm719_vm15 = vcmp.eq.f32.partialorder %v718_v42, 8.507059e+37 }
 0x142   :  { %v717_v44 = vsel %vm716_vm12, %v1654_v37, %v713_v60  ;;  %v1109_v8 = vmul.f32 %v1691_v22, %v932_v20  ;;  %v822_v48 = vsel %vm2793_vm13, %v2674_v36, %v818_v58  ;;  %vm2801_vm6 = vcmp.eq.f32.partialorder %v943_v18, 8.507059e+37  ;;  %vm2825_vm1 = vmor %vm939_vm7, %vm940_vm14 }
 0x143   :  { %v722_v34 = vsel %vm719_vm15, %v721_v53, %v717_v44  ;;  %v830_v2 = vmul.f32 %v1658_v41, %v2732_v21  ;;  %v1052_v56 = vsel %vm2749_vm4, %v2715_v23, %v1047_v33  ;;  %v1130_v37 = vadd.f32 %v2696_v5, %v1094_v13 }
 0x144   :  { %v1660_v38 = vpop.eup %1659  ;;  %v938_v40 = vadd.f32 %v2701_v61, %v937_v14  ;;  %v1095_v19 = vmul.f32 %v2363_v6, %v722_v34  ;;  %v1057_v36 = vmul.f32 %v2734_v47, %v1056_v63  ;;  %vm1060_vm0 = vweird.f32 %v2734_v47 }
 0x145   :  { %v1662_v31 = vpop.eup %1661  ;;  %v831_v54 = vsub.f32 1.0, %v830_v2  ;;  %v2814_v12 = vadd.f32 1.0, %v1660_v38  ;;  %v827_v17 = vsel %vm2763_vm5, %v826_v46, %v822_v48  ;;  %v840_v23 = vand.u32 2147483648, %v2732_v21 }
 0x146   :  { %v1131_v10 = vadd.f32 %v1130_v37, %v1095_v19  ;;  %v2819_v51 = vadd.f32 1.0, %v1662_v31  ;;  %vm835_vm2 = vweird.f32 %v1658_v41  ;;  %v838_v59 = vand.u32 2147483647, %v2732_v21 }
 0x147   :  { %v832_v16 = vmul.f32 %v1658_v41, %v831_v54  ;;  %1663 = vrcp.f32 %v2814_v12  ;;  %v942_v18 = vsel %vm2825_vm1, %v2701_v61, %v938_v40  ;;  %v1202_v27 = vadd.f32 %v2461_v57, %v2541_v0 }
 0x148   :  { %v1132_v26 = vrot.slane %v1131_v10, 4  ;;  %1665 = vrcp.f32 %v2819_v51  ;;  %v1102_v29 = vmul.f32 %v2273_v62, %v827_v17  ;;  %v1058_v30 = vadd.f32 %v2734_v47, %v1057_v36 }
 0x149   :  { %v833_v11 = vadd.f32 %v1658_v41, %v832_v16  ;;  %vm834_vm3 = vweird.f32 %v2732_v21  ;;  %v1063_v43 = vand.u32 2147483647, %v2676_v32  ;;  %v1065_v15 = vand.u32 2147483648, %v2676_v32 }
 0x14a   :  { %v1133_v4 = vadd.f32 %v1132_v26, %v1131_v10  ;;  %vm836_vm4 = vmor %vm834_vm3, %vm835_vm2  ;;  %v841_v61 = vor.u32 1.1754944e-38, %v840_v23  ;;  %v1117_v39 = vmul.f32 %v1691_v22, %v1052_v56  ;;  %vm1059_vm5 = vweird.f32 %v2676_v32  ;;  %v1692_v56 = vld [vmem:[#allocation7 + $0x10] sm:$0xff] }
 0x14b   :  { %v837_v24 = vsel %vm836_vm4, %v1658_v41, %v833_v11  ;;  %vm839_vm7 = vcmp.eq.f32.partialorder %v838_v59, 8.507059e+37  ;;  %v947_v0 = vsel %vm2801_vm6, %v946_v1, %v942_v18  ;;  %vm2847_vm8 = vmor %vm1059_vm5, %vm1060_vm0  ;;  %v1475_v20 = vmul.f32 -1.442695, %v1202_v27 }
 0x14c   :  { %v1134_v21 = vrot.slane %v1133_v4, 2  ;;  %v842_v42 = vsel %vm839_vm7, %v841_v61, %v837_v24  ;;  %v1165_v55 = vadd.f32 %v1109_v8, %v2679_v3  ;;  %v1148_v13 = vadd.f32 %v2712_v25, %v1102_v29 }
 0x14d   :  { %v1664_v58 = vpop.eup %1663  ;;  %v1062_v32 = vsel %vm2847_vm8, %v2734_v47, %v1058_v30  ;;  %v1103_v14 = vmul.f32 %v2363_v6, %v842_v42  ;;  %vm1064_vm9 = vcmp.eq.f32.partialorder %v1063_v43, 8.507059e+37  ;;  %v1066_v33 = vor.u32 1.1754944e-38, %v1065_v15 }
 0x14e   :  { %v1666_v60 = vpop.eup %1665  ;;  %v1135_v46 = vadd.f32 %v1134_v21, %v1133_v4  ;;  %v950_v63 = vmul.f32 %v1664_v58, %v2814_v12  ;;  %v1183_v53 = vadd.f32 %v1117_v39, %v2682_v35  ;;  %v1110_v41 = vmul.f32 %v2273_v62, %v947_v0 }
 0x14f   :  { %v1149_v49 = vadd.f32 %v1148_v13, %v1103_v14  ;;  %v1070_v3 = vmul.f32 %v1666_v60, %v2819_v51  ;;  %v1067_v25 = vsel %vm1064_vm9, %v1066_v33, %v1062_v32  ;;  %1667 = vpow2.f32 %v1475_v20 }
 0x150   :  { %v1136_v1 = vrot.slane %v1135_v46, 1  ;;  %v951_v44 = vsub.f32 1.0, %v950_v63  ;;  %v958_v22 = vand.u32 2147483647, %v2814_v12  ;;  %v960_v8 = vand.u32 2147483648, %v2814_v12 }
 0x151   :  { %v1150_v47 = vrot.slane %v1149_v49, 4  ;;  %v1071_v48 = vsub.f32 1.0, %v1070_v3  ;;  %vm955_vm10 = vweird.f32 %v1664_v58  ;;  %v1080_v35 = vand.u32 2147483648, %v2819_v51 }
 0x152   :  { %v1137_v52 = vadd.f32 %v1136_v1, %v1135_v46  ;;  %v952_v34 = vmul.f32 %v1664_v58, %v951_v44  ;;  %vm1075_vm11 = vweird.f32 %v1666_v60  ;;  %v1078_v38 = vand.u32 2147483647, %v2819_v51 }
 0x153   :  { %v1151_v2 = vadd.f32 %v1150_v47, %v1149_v49  ;;  %v1072_v62 = vmul.f32 %v1666_v60, %v1071_v48  ;;  %v1118_v37 = vmul.f32 %v1692_v56, %v1067_v25  ;;  %vm954_vm12 = vweird.f32 %v2814_v12 }
 0x154   :  { %v1197_v40 = vadd.f32 %v2461_v57, %v1137_v52  ;;  %v953_v19 = vadd.f32 %v1664_v58, %v952_v34  ;;  %vm956_vm13 = vmor %vm954_vm12, %vm955_vm10  ;;  %v961_v36 = vor.u32 1.1754944e-38, %v960_v8  ;;  %vm1074_vm14 = vweird.f32 %v2819_v51 }
 0x155   :  { %v1152_v31 = vrot.slane %v1151_v2, 2  ;;  %v1073_v54 = vadd.f32 %v1666_v60, %v1072_v62  ;;  %v1668_v17 = vpop.eup %1667  ;;  %vm959_vm15 = vcmp.eq.f32.partialorder %v958_v22, 8.507059e+37  ;;  %vm1076_vm6 = vmor %vm1074_vm14, %vm1075_vm11  ;;  %v1081_v5 = vor.u32 1.1754944e-38, %v1080_v35 }
 0x156   :  { %v1470_v10 = vmul.f32 -1.442695, %v1197_v40  ;;  %v957_v23 = vsel %vm956_vm13, %v1664_v58, %v953_v19  ;;  %vm1079_vm0 = vcmp.eq.f32.partialorder %v1078_v38, 8.507059e+37  ;;  %v1166_v26 = vadd.f32 %v1165_v55, %v1110_v41 }
 0x157   :  { %v1153_v16 = vadd.f32 %v1152_v31, %v1151_v2  ;;  %v962_v59 = vsel %vm959_vm15, %v961_v36, %v957_v23  ;;  %v1077_v18 = vsel %vm1076_vm6, %v1666_v60, %v1073_v54  ;;  %v1184_v29 = vadd.f32 %v1183_v53, %v1118_v37 }
 0x158   :  { %1669 = vpow2.f32 %v1470_v10  ;;  %v1111_v12 = vmul.f32 %v2363_v6, %v962_v59  ;;  %v1082_v27 = vsel %vm1079_vm0, %v1081_v5, %v1077_v18  ;;  %v2873_v4 = vadd.f32 1.0, %v2584_v50 }
 0x159   :  { %v1154_v30 = vrot.slane %v1153_v16, 1  ;;  %v1119_v51 = vmul.f32 %v2363_v6, %v1082_v27  ;;  %1671 = vrcp.f32 %v2656_v7  ;;  %v2875_v39 = vadd.f32 1.0, %v1668_v17 }
 0x15a   :  { %v1167_v11 = vadd.f32 %v1166_v26, %v1111_v12  ;;  %1673 = vrcp.f32 %v2873_v4  ;;  %v1237_v13 = vmul.f32 %v2620_v9, %v2539_v45  ;;  %vm1242_vm1 = vweird.f32 %v2620_v9 }
 0x15b   :  { %v1155_v43 = vadd.f32 %v1154_v30, %v1153_v16  ;;  %v1185_v15 = vadd.f32 %v1184_v29, %v1119_v51  ;;  %1675 = vrcp.f32 %v2875_v39  ;;  %v1247_v37 = vand.u32 2147483648, %v2539_v45 }
 0x15c   :  { %v1168_v61 = vrot.slane %v1167_v11, 4  ;;  %v1238_v53 = vsub.f32 1.0, %v1237_v13  ;;  %v1275_v31 = vand.u32 2147483647, %v2656_v7  ;;  %vm1241_vm2 = vweird.f32 %v2539_v45 }
 0x15d   :  { %v1199_v24 = vadd.f32 %v2461_v57, %v1155_v43  ;;  %v1186_v0 = vrot.slane %v1185_v15, 4  ;;  %v1277_v10 = vand.u32 2147483648, %v2656_v7  ;;  %vm2920_vm4 = vmor %vm1241_vm2, %vm1242_vm1  ;;  %v1248_v16 = vor.u32 1.1754944e-38, %v1247_v37 }
 0x15e   :  { %v1670_v28 = vpop.eup %1669  ;;  %v1169_v21 = vadd.f32 %v1168_v61, %v1167_v11  ;;  %v1239_v52 = vmul.f32 %v2620_v9, %v1238_v53  ;;  %vm1271_vm8 = vweird.f32 %v2656_v7  ;;  %vm2937_vm9 = vcmp.eq.f32.partialorder %v1275_v31, 8.507059e+37 }
 0x15f   :  { %v2878_v42 = vadd.f32 1.0, %v1670_v28  ;;  %v1472_v20 = vmul.f32 -1.442695, %v1199_v24  ;;  %v1187_v6 = vadd.f32 %v1186_v0, %v1185_v15  ;;  %v2881_v58 = vpop.eup %1671  ;;  %v1278_v24 = vor.u32 1.1754944e-38, %v1277_v10 }
 0x160   :  { %v1170_v55 = vrot.slane %v1169_v21, 2  ;;  %v1267_v60 = vmul.f32 %v2881_v58, %v2656_v7  ;;  %v2889_v46 = vpop.eup %1673  ;;  %v1240_v19 = vadd.f32 %v2620_v9, %v1239_v52  ;;  %vm1272_vm3 = vweird.f32 %v2881_v58 }
 0x161   :  { %1677 = vrcp.f32 %v2878_v42  ;;  %v1188_v50 = vrot.slane %v1187_v6, 2  ;;  %v2891_v41 = vpop.eup %1675  ;;  %v1297_v34 = vmul.f32 %v2889_v46, %v2873_v4  ;;  %v1262_v26 = vand.u32 2147483648, %v2878_v42  ;;  %vm2946_vm11 = vmor %vm1271_vm8, %vm1272_vm3 }
 0x162   :  { %1679 = vpow2.f32 %v1472_v20  ;;  %v1171_v32 = vadd.f32 %v1170_v55, %v1169_v21  ;;  %v1268_v1 = vsub.f32 1.0, %v1267_v60  ;;  %v1327_v62 = vmul.f32 %v2891_v41, %v2875_v39 }
 0x163   :  { %v1189_v14 = vadd.f32 %v1188_v50, %v1187_v6  ;;  %v1298_v36 = vsub.f32 1.0, %v1297_v34  ;;  %v1244_v18 = vsel %vm2920_vm4, %v2620_v9, %v1240_v19  ;;  %vm1256_vm10 = vweird.f32 %v2878_v42 }
 0x164   :  { %v1172_v33 = vrot.slane %v1171_v32, 1  ;;  %v1269_v56 = vmul.f32 %v2881_v58, %v1268_v1  ;;  %v1328_v54 = vsub.f32 1.0, %v1327_v62  ;;  %v1260_v30 = vand.u32 2147483647, %v2878_v42 }
 0x165   :  { %v1190_v63 = vrot.slane %v1189_v14, 1  ;;  %v1299_v27 = vmul.f32 %v2889_v46, %v1298_v36  ;;  %vm1301_vm13 = vweird.f32 %v2873_v4  ;;  %vm1302_vm14 = vweird.f32 %v2889_v46 }
 0x166   :  { %v1173_v49 = vadd.f32 %v1172_v33, %v1171_v32  ;;  %v1270_v17 = vadd.f32 %v2881_v58, %v1269_v56  ;;  %v1329_v51 = vmul.f32 %v2891_v41, %v1328_v54  ;;  %vm1332_vm15 = vweird.f32 %v2891_v41  ;;  %vm2986_vm1 = vmor %vm1301_vm13, %vm1302_vm14 }
 0x167   :  { %v2893_v3 = vpop.eup %1677  ;;  %v1191_v25 = vadd.f32 %v1190_v63, %v1189_v14  ;;  %v1300_v20 = vadd.f32 %v2889_v46, %v1299_v27  ;;  %vm1261_vm6 = vcmp.eq.f32.partialorder %v1260_v30, 8.507059e+37  ;;  %v1305_v50 = vand.u32 2147483647, %v2873_v4 }
 0x168   :  { %v1680_v44 = vpop.eup %1679  ;;  %v1201_v47 = vadd.f32 %v2461_v57, %v1173_v49  ;;  %v1252_v22 = vmul.f32 %v2893_v3, %v2878_v42  ;;  %vm1257_vm7 = vweird.f32 %v2893_v3  ;;  %v1274_v61 = vsel %vm2946_vm11, %v2881_v58, %v1270_v17 }
 0x169   :  { %v2898_v8 = vadd.f32 1.0, %v1680_v44  ;;  %v1203_v48 = vadd.f32 %v2461_v57, %v1191_v25  ;;  %v1245_v57 = vand.u32 2147483647, %v2539_v45  ;;  %vm2957_vm12 = vmor %vm1256_vm10, %vm1257_vm7  ;;  %v1263_v42 = vor.u32 1.1754944e-38, %v1262_v26 }
 0x16a   :  { %v1474_v35 = vmul.f32 -1.442695, %v1201_v47  ;;  %v1253_v2 = vsub.f32 1.0, %v1252_v22  ;;  %v1330_v58 = vadd.f32 %v2891_v41, %v1329_v51  ;;  %v1307_v13 = vand.u32 2147483648, %v2873_v4 }
 0x16b   :  { %1681 = vrcp.f32 %v2898_v8  ;;  %v1476_v38 = vmul.f32 -1.442695, %v1203_v48  ;;  %vm2924_vm5 = vcmp.eq.f32.partialorder %v1245_v57, 8.507059e+37  ;;  %v1337_v32 = vand.u32 2147483648, %v2875_v39 }
 0x16c   :  { %1683 = vpow2.f32 %v1474_v35  ;;  %v1254_v40 = vmul.f32 %v2893_v3, %v1253_v2  ;;  %vm1331_vm2 = vweird.f32 %v2875_v39  ;;  %v1335_v33 = vand.u32 2147483647, %v2875_v39 }
 0x16d   :  { %1685 = vpow2.f32 %v1476_v38  ;;  %v1249_v63 = vsel %vm2924_vm5, %v1248_v16, %v1244_v18  ;;  %v1279_v53 = vsel %vm2937_vm9, %v1278_v24, %v1274_v61  ;;  %v1292_v49 = vand.u32 2147483648, %v2898_v8  ;;  %vm3002_vm3 = vmor %vm1331_vm2, %vm1332_vm15 }
 0x16e   :  { %v1255_v59 = vadd.f32 %v2893_v3, %v1254_v40  ;;  %v1304_v4 = vsel %vm2986_vm1, %v2889_v46, %v1300_v20  ;;  %vm1286_vm4 = vweird.f32 %v2898_v8  ;;  %v1290_v39 = vand.u32 2147483647, %v2898_v8 }
 0x16f   :  { %v1334_v25 = vsel %vm3002_vm3, %v2891_v41, %v1330_v58  ;;  %vm1306_vm7 = vcmp.eq.f32.partialorder %v1305_v50, 8.507059e+37  ;;  %v1308_v46 = vor.u32 1.1754944e-38, %v1307_v13  ;;  %v1338_v22 = vor.u32 1.1754944e-38, %v1337_v32 }
 0x170   :  { %v1259_v28 = vsel %vm2957_vm12, %v2893_v3, %v1255_v59  ;;  %vm1365_vm8 = vcmask 1041409   ;;  %vm1336_vm9 = vcmp.eq.f32.partialorder %v1335_v33, 8.507059e+37  ;;  %v1367_v34 = vrot.slane %v1279_v53, 6 }
 0x171   :  { %v2931_v45 = vpop.eup %1681  ;;  %v1264_v55 = vsel %vm1261_vm6, %v1263_v42, %v1259_v28  ;;  %v1293_v41 = vor.u32 1.1754944e-38, %v1292_v49  ;;  %v1309_v35 = vsel %vm1306_vm7, %v1308_v46, %v1304_v4  ;;  %v1339_v2 = vsel %vm1336_vm9, %v1338_v22, %v1334_v25 }
 0x172   :  { %v1684_v29 = vpop.eup %1683  ;;  %v1282_v9 = vmul.f32 %v2931_v45, %v2898_v8  ;;  %vm1287_vm0 = vweird.f32 %v2931_v45  ;;  %v1364_v1 = vrot.slane %v1264_v55, 7  ;;  %vm1291_vm10 = vcmp.eq.f32.partialorder %v1290_v39, 8.507059e+37 }
 0x173   :  { %v1686_v11 = vpop.eup %1685  ;;  %v2953_v43 = vadd.f32 1.0, %v1684_v29  ;;  %vm3011_vm5 = vmor %vm1286_vm4, %vm1287_vm0  ;;  %vm1368_vm11 = vcmask 1042434   ;;  %vm1371_vm12 = vcmask 1043459   ;;  %v1373_v16 = vrot.slane %v1309_v35, 4 }
 0x174   :  { %v2965_v0 = vadd.f32 1.0, %v1686_v11  ;;  %v1283_v21 = vsub.f32 1.0, %v1282_v9  ;;  %v1366_v56 = vsel %vm1365_vm8, %v1364_v1, %v1249_v63  ;;  %vm1374_vm1 = vcmask 1044484  }
 0x175   :  { %1687 = vrcp.f32 %v2953_v43  ;;  %v1322_v37 = vand.u32 2147483648, %v2953_v43  ;;  %v1320_v31 = vand.u32 2147483647, %v2953_v43  ;;  %v1369_v10 = vsel %vm1368_vm11, %v1367_v34, %v1366_v56 }
 0x176   :  { %v1284_v6 = vmul.f32 %v2931_v45, %v1283_v21  ;;  %1689 = vrcp.f32 %v2965_v0  ;;  %v1352_v36 = vand.u32 2147483648, %v2965_v0  ;;  %v1350_v17 = vand.u32 2147483647, %v2965_v0 }
 0x177   :  { %vm1316_vm15 = vweird.f32 %v2953_v43  ;;  %v1323_v59 = vor.u32 1.1754944e-38, %v1322_v37  ;;  %vm1346_vm0 = vweird.f32 %v2965_v0  ;;  %vm1321_vm2 = vcmp.eq.f32.partialorder %v1320_v31, 8.507059e+37 }
 0x178   :  { %v1285_v14 = vadd.f32 %v2931_v45, %v1284_v6  ;;  %v1353_v26 = vor.u32 1.1754944e-38, %v1352_v36  ;;  %vm1351_vm4 = vcmp.eq.f32.partialorder %v1350_v17, 8.507059e+37  ;;  %vm1380_vm7 = vcmask 1046534  }
 0x179   :  { %v1379_v51 = vrot.slane %v1339_v2, 2  ;;  %vm1383_vm8 = vcmask 1047559  }
 0x17a   :  { %v1289_v52 = vsel %vm3011_vm5, %v2931_v45, %v1285_v14  ;;  %vm1377_vm5 = vcmask 1045509  }
 0x17b   :  { %v1688_v44 = vpop.eup %1687  ;;  %v1294_v57 = vsel %vm1291_vm10, %v1293_v41, %v1289_v52 }
 0x17c   :  { %v1690_v48 = vpop.eup %1689  ;;  %v1312_v8 = vmul.f32 %v1688_v44, %v2953_v43  ;;  %vm1317_vm13 = vweird.f32 %v1688_v44  ;;  %v1370_v5 = vrot.slane %v1294_v57, 5 }
 0x17d   :  { %v1342_v62 = vmul.f32 %v1690_v48, %v2965_v0  ;;  %vm1347_vm14 = vweird.f32 %v1690_v48  ;;  %vm1318_vm6 = vmor %vm1316_vm15, %vm1317_vm13 }
 0x17e   :  { %v1313_v38 = vsub.f32 1.0, %v1312_v8  ;;  %vm1348_vm3 = vmor %vm1346_vm0, %vm1347_vm14  ;;  %v1372_v12 = vsel %vm1371_vm12, %v1370_v5, %v1369_v10 }
 0x17f   :  { %v1343_v40 = vsub.f32 1.0, %v1342_v62  ;;  %v1375_v9 = vsel %vm1374_vm1, %v1373_v16, %v1372_v12 }
 0x180   :  { %v1314_v19 = vmul.f32 %v1688_v44, %v1313_v38 }
 0x181   :  { %v1344_v54 = vmul.f32 %v1690_v48, %v1343_v40 }
 0x182   :  { %v1315_v23 = vadd.f32 %v1688_v44, %v1314_v19 }
 0x183   :  { %v1345_v45 = vadd.f32 %v1690_v48, %v1344_v54 }
 0x184   :  { %v1319_v18 = vsel %vm1318_vm6, %v1688_v44, %v1315_v23 }
 0x185   :  { %v1324_v27 = vsel %vm1321_vm2, %v1323_v59, %v1319_v18  ;;  %v1349_v29 = vsel %vm1348_vm3, %v1690_v48, %v1345_v45 }
 0x186   :  { %v1354_v30 = vsel %vm1351_vm4, %v1353_v26, %v1349_v29  ;;  %v1376_v7 = vrot.slane %v1324_v27, 3 }
 0x187   :  { %v1382_v43 = vrot.slane %v1354_v30, 1 }
 0x188   :  { %v1378_v11 = vsel %vm1377_vm5, %v1376_v7, %v1375_v9 }
 0x189   :  { %v1381_v15 = vsel %vm1380_vm7, %v1379_v51, %v1378_v11 }
 0x18a   :  { %v1384_v61 = vsel %vm1383_vm8, %v1382_v43, %v1381_v15 }
 0x18b   :  { %1386 = vst [vmem:[#allocation8] sm:$0xff] %v1384_v61 }
 0x18c   :  { %1397 = dma.vmem_to_hbm [thread:$0]  %s1393_s7, 128, %s1395_s10, [#allocation4]  }
 0x18d   :  { %1793 = dma.done.wait [#allocation4], 128  }
 0x18e   :  { %1794 = vsyncadd [#allocation4], 4294967168 }
 0x18f   :  { %1402 = vsyncpa [#allocation3], 1 }
 0x190   :  { %1403 = vsyncpa [#allocation6], 1 }
 0x191   :  { %1404 = vsyncpa [#allocation4], 1 }

</bundles_post_ra>
